<compile_context>
chip_gen: v5e
topology: v5e:2x2
jax: 0.10.0
libtpu: 0.0.40
codegen_flags: <defaults>
</compile_context>

<pallas_src>
import functools

import jax
import jax.numpy as jnp
from jax.experimental import pallas as pl
from jax.experimental.pallas import tpu as pltpu


# ------------------------------ fused kernel --------------------------------

def _fused_forward_kernel(ids_ref, mask_ref, img_ref,
                          w_text_ref, b_text_ref,
                          w_vis_ref, b_vis_ref,
                          w_layocr_ref, b_layocr_ref,
                          pmat_ref,
                          w_fuse_ref, b_fuse_ref,
                          w_cls1_ref, b_cls1_ref, w_cls2_ref, b_cls2_ref,
                          text_out_ref, vis_out_ref, small_out_ref,
                          *, batch, seq, hidden, num_classes, vocab, small_w):
    bs = batch * seq

    # ---- text encoder: one_hot(ids) @ (tok_emb @ W_text) + b, tanh ----
    ids = ids_ref[...]                                                   # [B*S, 1] int32
    iota = jax.lax.broadcasted_iota(jnp.int32, (bs, vocab), 1)
    onehot = (ids == iota).astype(jnp.float32)                           # [B*S, V]
    text2 = jnp.tanh(
        jnp.dot(onehot, w_text_ref[...], preferred_element_type=jnp.float32)
        + b_text_ref[...])                                               # [B*S, H]
    text3 = text2.reshape(batch, seq, hidden)                            # [B, S, H]
    text_out_ref[...] = text3

    # ---- vision encoder: patch-embed folded into one big matmul, tanh ----
    img = img_ref[...]                                                   # [B, C*H*W]
    vis = jnp.tanh(
        jnp.dot(img, w_vis_ref[...], preferred_element_type=jnp.float32)
        + b_vis_ref[...])                                                # [B, P*H] (lane-dense)
    vis_out_ref[...] = vis

    # ---- layout + OCR encoders: pooling folded into one joint matmul, ReLU ----
    layocr = jnp.maximum(
        jnp.dot(img, w_layocr_ref[...], preferred_element_type=jnp.float32)
        + b_layocr_ref[...], 0.0)                                        # [B, 2H]
    layout = layocr[:, :hidden]
    ocr = layocr[:, hidden:]

    # ---- fusion: masked text pool + vision pool + single K=4H matmul, ReLU ----
    mask = mask_ref[...]                                                 # [B, S]
    denom = jnp.maximum(jnp.sum(mask, axis=1, keepdims=True), 1.0)       # [B, 1]
    t_pool = (jnp.sum(text3 * mask[:, :, None], axis=1)
              * pl.reciprocal(denom, approx=True))                       # [B, H]
    v_pool = jnp.dot(vis, pmat_ref[...],
                     preferred_element_type=jnp.float32)                 # mean over P via MXU
    fuse_in = jnp.concatenate([t_pool, v_pool, layout, ocr], axis=-1)    # [B, 4H]
    fused = jnp.maximum(
        jnp.dot(fuse_in, w_fuse_ref[...], preferred_element_type=jnp.float32)
        + b_fuse_ref[...], 0.0)                                          # [B, H]

    # ---- classifier: Linear -> ReLU -> Dropout(eval: identity) -> Linear ----
    h = jnp.maximum(
        jnp.dot(fused, w_cls1_ref[...], preferred_element_type=jnp.float32)
        + b_cls1_ref[...], 0.0)
    logits = (jnp.dot(h, w_cls2_ref[...], preferred_element_type=jnp.float32)
              + b_cls2_ref[...])                                         # [B, C]

    # ---- lane-dense packed store of the small per-batch outputs ----
    pieces = [layout, ocr, fused, logits]
    pad_w = small_w - (3 * hidden + num_classes)
    if pad_w > 0:
        pieces.append(jnp.zeros((batch, pad_w), jnp.float32))
    small_out_ref[...] = jnp.concatenate(pieces, axis=-1)                # [B, small_w]


# ------------------------------- model glue ---------------------------------

class EnhancedMultimodalModelPallas:
    def __init__(self, key, *, vocab=64, emb=32, hidden=32, num_classes=8,
                 channels=4, img=16, patch=4):
        self.vocab, self.emb, self.hidden = vocab, emb, hidden
        self.num_classes = num_classes
        self.channels, self.img, self.patch = channels, img, patch
        hp = img // patch
        self.n_patches = hp * hp
        patch_dim = channels * patch * patch
        chw = channels * img * img

        def init(k, shape, scale=0.02):
            return (scale * jax.random.normal(k, shape)).astype(jnp.float32)

        ks = jax.random.split(key, 16)
        # raw (module-style) parameters
        tok_emb = init(ks[0], (vocab, emb))
        w_text = init(ks[1], (emb, hidden))
        w_vis = init(ks[2], (patch_dim, hidden))
        w_lay = init(ks[3], (channels, hidden))
        w_ocr = init(ks[4], (channels, hidden))
        wt = init(ks[5], (hidden, hidden))
        wv = init(ks[6], (hidden, hidden))
        wl = init(ks[7], (hidden, hidden))
        wo = init(ks[8], (hidden, hidden))
        self.w_cls1 = init(ks[9], (hidden, hidden))
        self.w_cls2 = init(ks[10], (hidden, num_classes))

        self.b_text = jnp.zeros((1, hidden), jnp.float32)
        b_vis = jnp.zeros((1, hidden), jnp.float32)
        b_lay = jnp.zeros((1, hidden), jnp.float32)
        b_ocr = jnp.zeros((1, hidden), jnp.float32)
        self.b_fuse = jnp.zeros((1, hidden), jnp.float32)
        self.b_cls1 = jnp.zeros((1, hidden), jnp.float32)
        self.b_cls2 = jnp.zeros((1, num_classes), jnp.float32)

        # ---- fold the pure-linear preprocessing into the weights (one-time) ----
        # (1) embedding lookup + Linear  ==  one_hot(ids) @ (tok_emb @ W_text)
        self.w_text_comb = tok_emb @ w_text                              # [V, H]

        # (2) NCHW -> patches -> patch-embed Linear  ==  img_flat @ W_vis_big
        #     img_flat index: c*img*img + y*img + x (row-major NCHW flatten)
        #     patch-vector index (NHWC (dy, dx, c) flatten, matches prior version;
        #     TODO(synk): PyTorch Conv2d patch-embed would use (c, dy, dx) order):
        c_idx, y_idx, x_idx = jnp.meshgrid(jnp.arange(channels), jnp.arange(img),
                                           jnp.arange(img), indexing="ij")
        k_of_row = ((y_idx % patch) * (patch * channels)
                    + (x_idx % patch) * channels + c_idx).reshape(-1)    # [CHW]
        p_of_row = ((y_idx // patch) * hp + (x_idx // patch)).reshape(-1)  # [CHW]
        cols = jnp.arange(self.n_patches * hidden)
        blk_of_col = cols // hidden
        h_of_col = cols % hidden
        self.w_vis_big = (w_vis[k_of_row][:, h_of_col]
                          * (p_of_row[:, None] == blk_of_col[None, :]
                             ).astype(jnp.float32))                      # [CHW, P*H]
        self.b_vis_big = jnp.tile(b_vis, (1, self.n_patches))            # [1, P*H]

        # (3) layout & OCR: spatial mean-pool + Linear, done as ONE joint matmul
        c_of_row = jnp.arange(chw) // (img * img)
        inv_hw = 1.0 / float(img * img)
        self.w_layocr = jnp.concatenate(
            [w_lay[c_of_row], w_ocr[c_of_row]], axis=1) * inv_hw         # [CHW, 2H]
        self.b_layocr = jnp.concatenate([b_lay, b_ocr], axis=1)          # [1, 2H]

        # (4) vision mean-pool over patches as a matmul
        self.pmat = (jnp.tile(jnp.eye(hidden, dtype=jnp.float32),
                              (self.n_patches, 1)) / self.n_patches)     # [P*H, H]

        # (5) four fusion matmuls stacked into one K=4H contraction
        self.w_fuse = jnp.concatenate([wt, wv, wl, wo], axis=0)          # [4H, H]

        # lane-dense packed slab for {layout, ocr, fused, logits}
        self.small_w = max(128, ((3 * hidden + num_classes + 127) // 128) * 128)

    def __call__(self, images, input_ids, attention_mask):
        B, C, Him, Wim = images.shape
        S = input_ids.shape[1]
        H = self.hidden
        P = self.n_patches
        ncls = self.num_classes

        img_flat = images.reshape(B, C * Him * Wim)                      # free reshape
        ids2 = input_ids.reshape(B * S, 1).astype(jnp.int32)
        mask = attention_mask.astype(jnp.float32)

        vmem = pltpu.MemorySpace.VMEM
        n_inputs = 16
        kernel = functools.partial(
            _fused_forward_kernel,
            batch=B, seq=S, hidden=H, num_classes=ncls,
            vocab=self.vocab, small_w=self.small_w)

        text_out, vis_out, small_out = pl.pallas_call(
            kernel,
            out_shape=(
                jax.ShapeDtypeStruct((B, S, H), jnp.float32),
                jax.ShapeDtypeStruct((B, P * H), jnp.float32),
                jax.ShapeDtypeStruct((B, self.small_w), jnp.float32),
            ),
            in_specs=[pl.BlockSpec(memory_space=vmem) for _ in range(n_inputs)],
            out_specs=(
                pl.BlockSpec(memory_space=vmem),
                pl.BlockSpec(memory_space=vmem),
                pl.BlockSpec(memory_space=vmem),
            ),
        )(ids2, mask, img_flat,
          self.w_text_comb, self.b_text,
          self.w_vis_big, self.b_vis_big,
          self.w_layocr, self.b_layocr,
          self.pmat,
          self.w_fuse, self.b_fuse,
          self.w_cls1, self.b_cls1, self.w_cls2, self.b_cls2)

        text_features = text_out                                         # [B, S, H]
        vision_features = vis_out.reshape(B, P, H)                       # [B, P, H]
        layout_features = small_out[:, 0:H]
        ocr_features = small_out[:, H:2 * H]
        fused_features = small_out[:, 2 * H:3 * H]
        logits = small_out[:, 3 * H:3 * H + ncls]

        return {
            "logits": logits,
            "text_features": text_features,
            "vision_features": vision_features,
            "layout_features": layout_features,
            "ocr_features": ocr_features,
            "fused_features": fused_features,
        }


if __name__ == "__main__":
    key = jax.random.PRNGKey(0)
    k_model, k_img, k_ids = jax.random.split(key, 3)

    B, C, H, W = 2, 4, 16, 16
    S = 8
    model = EnhancedMultimodalModelPallas(k_model, vocab=64, emb=32, hidden=32,
                                          num_classes=8, channels=C, img=H, patch=4)

    images = jax.random.normal(k_img, (B, C, H, W), dtype=jnp.float32)
    input_ids = jax.random.randint(k_ids, (B, S), 0, 64, dtype=jnp.int32)
    attention_mask = jnp.ones((B, S), dtype=jnp.int32).at[1, 6:].set(0)

    outputs = model(images, input_ids, attention_mask)
    jax.block_until_ready(outputs)

    assert outputs["logits"].shape == (B, 8)
    assert outputs["text_features"].shape == (B, S, 32)
    assert outputs["vision_features"].shape == (B, 16, 32)
    assert outputs["layout_features"].shape == (B, 32)
    assert outputs["ocr_features"].shape == (B, 32)
    assert outputs["fused_features"].shape == (B, 32)
    for v in outputs.values():
        assert bool(jnp.all(jnp.isfinite(v)))
    print("KERNEL_OK")
</pallas_src>

<mosaic_0001>
module attributes {stable_mosaic.version = 11 : i64} {
  func.func @_fused_forward_kernel(%arg0: memref<16x1xi32, #tpu.memory_space<vmem>>, %arg1: memref<2x8xf32, #tpu.memory_space<vmem>>, %arg2: memref<2x1024xf32, #tpu.memory_space<vmem>>, %arg3: memref<64x32xf32, #tpu.memory_space<vmem>>, %arg4: memref<1x32xf32, #tpu.memory_space<vmem>>, %arg5: memref<1024x512xf32, #tpu.memory_space<vmem>>, %arg6: memref<1x512xf32, #tpu.memory_space<vmem>>, %arg7: memref<1024x64xf32, #tpu.memory_space<vmem>>, %arg8: memref<1x64xf32, #tpu.memory_space<vmem>>, %arg9: memref<512x32xf32, #tpu.memory_space<vmem>>, %arg10: memref<128x32xf32, #tpu.memory_space<vmem>>, %arg11: memref<1x32xf32, #tpu.memory_space<vmem>>, %arg12: memref<32x32xf32, #tpu.memory_space<vmem>>, %arg13: memref<1x32xf32, #tpu.memory_space<vmem>>, %arg14: memref<32x8xf32, #tpu.memory_space<vmem>>, %arg15: memref<1x8xf32, #tpu.memory_space<vmem>>, %arg16: memref<2x8x32xf32, #tpu.memory_space<vmem>>, %arg17: memref<2x512xf32, #tpu.memory_space<vmem>>, %arg18: memref<2x128xf32, #tpu.memory_space<vmem>>) attributes {dimension_semantics = [], scalar_prefetch = 0 : i64, scratch_operands = 0 : i64, tpu.core_type = #tpu.core_type<tc>} {
    %c0 = arith.constant 0 : index
    %c0_0 = arith.constant 0 : index
    %0 = vector.load %arg0[%c0, %c0_0] : memref<16x1xi32, #tpu.memory_space<vmem>>, vector<16x1xi32>
    %1 = tpu.iota {dimensions = array<i32: 1>} : vector<16x64xi32>
    %2 = vector.broadcast %0 : vector<16x1xi32> to vector<16x64xi32>
    %3 = arith.cmpi eq, %2, %1 : vector<16x64xi32>
    %4 = arith.extui %3 : vector<16x64xi1> to vector<16x64xi32>
    %5 = arith.sitofp %4 : vector<16x64xi32> to vector<16x64xf32>
    %c0_1 = arith.constant 0 : index
    %c0_2 = arith.constant 0 : index
    %6 = vector.load %arg3[%c0_1, %c0_2] : memref<64x32xf32, #tpu.memory_space<vmem>>, vector<64x32xf32>
    %cst = arith.constant dense<0.000000e+00> : vector<16x32xf32>
    %7 = tpu.matmul %5, %6, %cst {dimension_numbers = #tpu.dot_dimension_numbers<[1], [0], [0], [1], [0, 0, 1, 1], [], []>} : vector<16x64xf32>, vector<64x32xf32>, vector<16x32xf32> -> vector<16x32xf32>
    %c0_3 = arith.constant 0 : index
    %c0_4 = arith.constant 0 : index
    %8 = vector.load %arg4[%c0_3, %c0_4] : memref<1x32xf32, #tpu.memory_space<vmem>>, vector<1x32xf32>
    %9 = vector.broadcast %8 : vector<1x32xf32> to vector<16x32xf32>
    %10 = arith.addf %7, %9 : vector<16x32xf32>
    %11 = math.tanh %10 : vector<16x32xf32>
    %12 = vector.shape_cast %11 : vector<16x32xf32> to vector<2x8x32xf32>
    %c0_5 = arith.constant 0 : index
    %c0_6 = arith.constant 0 : index
    %c0_7 = arith.constant 0 : index
    %13 = vector.load %arg16[%c0_5, %c0_6, %c0_7] : memref<2x8x32xf32, #tpu.memory_space<vmem>>, vector<2x8x32xf32>
    tpu.vector_store %arg16[%c0_5, %c0_6, %c0_7], %12 {strides = array<i32>} : memref<2x8x32xf32, #tpu.memory_space<vmem>>, vector<2x8x32xf32>,
    %c0_8 = arith.constant 0 : index
    %c0_9 = arith.constant 0 : index
    %14 = vector.load %arg2[%c0_8, %c0_9] : memref<2x1024xf32, #tpu.memory_space<vmem>>, vector<2x1024xf32>
    %c0_10 = arith.constant 0 : index
    %c0_11 = arith.constant 0 : index
    %15 = vector.load %arg5[%c0_10, %c0_11] : memref<1024x512xf32, #tpu.memory_space<vmem>>, vector<1024x512xf32>
    %cst_12 = arith.constant dense<0.000000e+00> : vector<2x512xf32>
    %16 = tpu.matmul %14, %15, %cst_12 {dimension_numbers = #tpu.dot_dimension_numbers<[1], [0], [0], [1], [0, 0, 1, 1], [], []>} : vector<2x1024xf32>, vector<1024x512xf32>, vector<2x512xf32> -> vector<2x512xf32>
    %c0_13 = arith.constant 0 : index
    %c0_14 = arith.constant 0 : index
    %17 = vector.load %arg6[%c0_13, %c0_14] : memref<1x512xf32, #tpu.memory_space<vmem>>, vector<1x512xf32>
    %18 = vector.broadcast %17 : vector<1x512xf32> to vector<2x512xf32>
    %19 = arith.addf %16, %18 : vector<2x512xf32>
    %20 = math.tanh %19 : vector<2x512xf32>
    %c0_15 = arith.constant 0 : index
    %c0_16 = arith.constant 0 : index
    %21 = vector.load %arg17[%c0_15, %c0_16] : memref<2x512xf32, #tpu.memory_space<vmem>>, vector<2x512xf32>
    tpu.vector_store %arg17[%c0_15, %c0_16], %20 {strides = array<i32>} : memref<2x512xf32, #tpu.memory_space<vmem>>, vector<2x512xf32>,
    %c0_17 = arith.constant 0 : index
    %c0_18 = arith.constant 0 : index
    %22 = vector.load %arg7[%c0_17, %c0_18] : memref<1024x64xf32, #tpu.memory_space<vmem>>, vector<1024x64xf32>
    %cst_19 = arith.constant dense<0.000000e+00> : vector<2x64xf32>
    %23 = tpu.matmul %14, %22, %cst_19 {dimension_numbers = #tpu.dot_dimension_numbers<[1], [0], [0], [1], [0, 0, 1, 1], [], []>} : vector<2x1024xf32>, vector<1024x64xf32>, vector<2x64xf32> -> vector<2x64xf32>
    %c0_20 = arith.constant 0 : index
    %c0_21 = arith.constant 0 : index
    %24 = vector.load %arg8[%c0_20, %c0_21] : memref<1x64xf32, #tpu.memory_space<vmem>>, vector<1x64xf32>
    %25 = vector.broadcast %24 : vector<1x64xf32> to vector<2x64xf32>
    %26 = arith.addf %23, %25 : vector<2x64xf32>
    %cst_22 = arith.constant 0.000000e+00 : f32
    %27 = vector.broadcast %cst_22 : f32 to vector<2x64xf32>
    %28 = arith.maximumf %26, %27 : vector<2x64xf32>
    %29 = vector.extract_strided_slice %28 {offsets = [0, 0], sizes = [2, 32], strides = [1, 1]} : vector<2x64xf32> to vector<2x32xf32>
    %30 = vector.extract_strided_slice %28 {offsets = [0, 32], sizes = [2, 32], strides = [1, 1]} : vector<2x64xf32> to vector<2x32xf32>
    %c0_23 = arith.constant 0 : index
    %c0_24 = arith.constant 0 : index
    %31 = vector.load %arg1[%c0_23, %c0_24] : memref<2x8xf32, #tpu.memory_space<vmem>>, vector<2x8xf32>
    %cst_25 = arith.constant dense<0.000000e+00> : vector<2xf32>
    %32 = vector.multi_reduction <add>, %31, %cst_25 [1] : vector<2x8xf32> to vector<2xf32>
    %33 = vector.shape_cast %32 : vector<2xf32> to vector<2x1xf32>
    %cst_26 = arith.constant 1.000000e+00 : f32
    %34 = vector.broadcast %cst_26 : f32 to vector<2x1xf32>
    %35 = arith.maximumf %33, %34 : vector<2x1xf32>
    %36 = vector.shape_cast %31 : vector<2x8xf32> to vector<2x8x1xf32>
    %37 = vector.broadcast %36 : vector<2x8x1xf32> to vector<2x8x32xf32>
    %38 = arith.mulf %12, %37 : vector<2x8x32xf32>
    %cst_27 = arith.constant dense<0.000000e+00> : vector<2x32xf32>
    %39 = vector.multi_reduction <add>, %38, %cst_27 [1] : vector<2x8x32xf32> to vector<2x32xf32>
    %40 = tpu.reciprocal %35 {approx = true} : vector<2x1xf32> -> vector<2x1xf32>
    %41 = vector.broadcast %40 : vector<2x1xf32> to vector<2x32xf32>
    %42 = arith.mulf %39, %41 : vector<2x32xf32>
    %c0_28 = arith.constant 0 : index
    %c0_29 = arith.constant 0 : index
    %43 = vector.load %arg9[%c0_28, %c0_29] : memref<512x32xf32, #tpu.memory_space<vmem>>, vector<512x32xf32>
    %cst_30 = arith.constant dense<0.000000e+00> : vector<2x32xf32>
    %44 = tpu.matmul %20, %43, %cst_30 {dimension_numbers = #tpu.dot_dimension_numbers<[1], [0], [0], [1], [0, 0, 1, 1], [], []>} : vector<2x512xf32>, vector<512x32xf32>, vector<2x32xf32> -> vector<2x32xf32>
    %45 = tpu.concatenate %42, %44, %29, %30 in 1 : vector<2x32xf32>, vector<2x32xf32>, vector<2x32xf32>, vector<2x32xf32> -> vector<2x128xf32>
    %c0_31 = arith.constant 0 : index
    %c0_32 = arith.constant 0 : index
    %46 = vector.load %arg10[%c0_31, %c0_32] : memref<128x32xf32, #tpu.memory_space<vmem>>, vector<128x32xf32>
    %cst_33 = arith.constant dense<0.000000e+00> : vector<2x32xf32>
    %47 = tpu.matmul %45, %46, %cst_33 {dimension_numbers = #tpu.dot_dimension_numbers<[1], [0], [0], [1], [0, 0, 1, 1], [], []>} : vector<2x128xf32>, vector<128x32xf32>, vector<2x32xf32> -> vector<2x32xf32>
    %c0_34 = arith.constant 0 : index
    %c0_35 = arith.constant 0 : index
    %48 = vector.load %arg11[%c0_34, %c0_35] : memref<1x32xf32, #tpu.memory_space<vmem>>, vector<1x32xf32>
    %49 = vector.broadcast %48 : vector<1x32xf32> to vector<2x32xf32>
    %50 = arith.addf %47, %49 : vector<2x32xf32>
    %cst_36 = arith.constant 0.000000e+00 : f32
    %51 = vector.broadcast %cst_36 : f32 to vector<2x32xf32>
    %52 = arith.maximumf %50, %51 : vector<2x32xf32>
    %c0_37 = arith.constant 0 : index
    %c0_38 = arith.constant 0 : index
    %53 = vector.load %arg12[%c0_37, %c0_38] : memref<32x32xf32, #tpu.memory_space<vmem>>, vector<32x32xf32>
    %cst_39 = arith.constant dense<0.000000e+00> : vector<2x32xf32>
    %54 = tpu.matmul %52, %53, %cst_39 {dimension_numbers = #tpu.dot_dimension_numbers<[1], [0], [0], [1], [0, 0, 1, 1], [], []>} : vector<2x32xf32>, vector<32x32xf32>, vector<2x32xf32> -> vector<2x32xf32>
    %c0_40 = arith.constant 0 : index
    %c0_41 = arith.constant 0 : index
    %55 = vector.load %arg13[%c0_40, %c0_41] : memref<1x32xf32, #tpu.memory_space<vmem>>, vector<1x32xf32>
    %56 = vector.broadcast %55 : vector<1x32xf32> to vector<2x32xf32>
    %57 = arith.addf %54, %56 : vector<2x32xf32>
    %cst_42 = arith.constant 0.000000e+00 : f32
    %58 = vector.broadcast %cst_42 : f32 to vector<2x32xf32>
    %59 = arith.maximumf %57, %58 : vector<2x32xf32>
    %c0_43 = arith.constant 0 : index
    %c0_44 = arith.constant 0 : index
    %60 = vector.load %arg14[%c0_43, %c0_44] : memref<32x8xf32, #tpu.memory_space<vmem>>, vector<32x8xf32>
    %cst_45 = arith.constant dense<0.000000e+00> : vector<2x8xf32>
    %61 = tpu.matmul %59, %60, %cst_45 {dimension_numbers = #tpu.dot_dimension_numbers<[1], [0], [0], [1], [0, 0, 1, 1], [], []>} : vector<2x32xf32>, vector<32x8xf32>, vector<2x8xf32> -> vector<2x8xf32>
    %c0_46 = arith.constant 0 : index
    %c0_47 = arith.constant 0 : index
    %62 = vector.load %arg15[%c0_46, %c0_47] : memref<1x8xf32, #tpu.memory_space<vmem>>, vector<1x8xf32>
    %63 = vector.broadcast %62 : vector<1x8xf32> to vector<2x8xf32>
    %64 = arith.addf %61, %63 : vector<2x8xf32>
    %cst_48 = arith.constant 0.000000e+00 : f32
    %65 = vector.broadcast %cst_48 : f32 to vector<2x24xf32>
    %66 = tpu.concatenate %29, %30, %52, %64, %65 in 1 : vector<2x32xf32>, vector<2x32xf32>, vector<2x32xf32>, vector<2x8xf32>, vector<2x24xf32> -> vector<2x128xf32>
    %c0_49 = arith.constant 0 : index
    %c0_50 = arith.constant 0 : index
    %67 = vector.load %arg18[%c0_49, %c0_50] : memref<2x128xf32, #tpu.memory_space<vmem>>, vector<2x128xf32>
    tpu.vector_store %arg18[%c0_49, %c0_50], %66 {strides = array<i32>} : memref<2x128xf32, #tpu.memory_space<vmem>>, vector<2x128xf32>,
    return
  }
}

</mosaic_0001>

<bundles_post_ra>
// kernel: tpu_custom_call.1
= control target key start
LH: loop header
LB: loop body
LE: loop exit
PB: predicated region body
PF: predicated region fallthrough
CT: control target
= control target key end

     0   :  { %s3470_s0 = inlined_call_operand.vmem [shape: s32[16,1], index: 0, kind: input, shape index: {}]   ;;  %s3471_s1 = inlined_call_operand.hbm [shape: f32[2,8], index: 1, kind: input, shape index: {}]   ;;  %s3472_s2 = inlined_call_operand.hbm [shape: f32[2,1024], index: 2, kind: input, shape index: {}]   ;;  %s3473_s3 = inlined_call_operand.vmem [shape: f32[64,32], index: 3, kind: input, shape index: {}]   ;;  %s3474_s4 = inlined_call_operand.hbm [shape: f32[1,32], index: 4, kind: input, shape index: {}]   ;;  %s3475_s5 = inlined_call_operand.hbm [shape: f32[1024,512], index: 5, kind: input, shape index: {}]   ;;  %s3476_s6 = inlined_call_operand.hbm [shape: f32[1,512], index: 6, kind: input, shape index: {}]   ;;  %s3477_s7 = inlined_call_operand.vmem [shape: f32[1024,64], index: 7, kind: input, shape index: {}]   ;;  %s3478_s8 = inlined_call_operand.hbm [shape: f32[1,64], index: 8, kind: input, shape index: {}]   ;;  %s3479_s9 = inlined_call_operand.vmem [shape: f32[512,32], index: 9, kind: input, shape index: {}]   ;;  %s3480_s10 = inlined_call_operand.vmem [shape: f32[128,32], index: 10, kind: input, shape index: {}]   ;;  %s3481_s11 = inlined_call_operand.hbm [shape: f32[1,32], index: 11, kind: input, shape index: {}]   ;;  %s3482_s12 = inlined_call_operand.hbm [shape: f32[32,32], index: 12, kind: input, shape index: {}]   ;;  %s3483_s13 = inlined_call_operand.hbm [shape: f32[1,32], index: 13, kind: input, shape index: {}]   ;;  %s3484_s14 = inlined_call_operand.vmem [shape: f32[32,8], index: 14, kind: input, shape index: {}]   ;;  %s3485_s15 = inlined_call_operand.hbm [shape: f32[1,8], index: 15, kind: input, shape index: {}]   ;;  %s3486_s16 = inlined_call_operand.hbm [shape: f32[2,8,32], index: 16, kind: output, shape index: {0}]   ;;  %s3487_s17 = inlined_call_operand.hbm [shape: f32[2,512], index: 17, kind: output, shape index: {1}]   ;;  %s3488_s18 = inlined_call_operand.hbm [shape: f32[2,128], index: 18, kind: output, shape index: {2}]  }
   0x1   :  { %3490 = sst [smem:[#allocation31_spill]] %s3470_s0 }
   0x2   :  { %3491 = sst [smem:[#allocation32_spill]] %s3471_s1 }
   0x3   :  { %3492 = sst [smem:[#allocation33_spill]] %s3472_s2 }
   0x4   :  { %24 = vsyncpa [#allocation3], 0 }
   0x5   :  { %25 = vsyncpa [#allocation6], 0 }
   0x6   :  { %26 = vsyncpa [#allocation9], 0 }
   0x7   :  { %27 = vsyncpa [#allocation12], 0 }
   0x8   :  { %28 = vsyncpa [#allocation15], 0 }
   0x9   :  { %29 = vsyncpa [#allocation18], 0 }
   0xa   :  { %30 = vsyncpa [#allocation4], 0  ;;  %s3493_s29 = sld [smem:[#allocation33_spill]] }
  0x10   :  { %s50_s30 = sshll.u32 %s3493_s29, 4  ;;  %s51_s30 = int_to_ptr.hbm [resolvable:$true] %s50_s30 }
  0x11   :  { %31 = vsyncpa [#allocation21], 0  ;;  %s2530_s0 = smov [#allocation5]   ;;  %s73_s21 = sshll.u32 %s3475_s5, 4  ;;  %s74_s21 = int_to_ptr.hbm [resolvable:$true] %s73_s21 }
  0x12   :  { %s52_s19 = sshll.u32 %s2530_s0, 4  ;;  %s2531_s22 = smov [#allocation8]   ;;  %s53_s19 = int_to_ptr.vmem [resolvable:$true] %s52_s19 }
  0x13   :  { %55 = dma.hbm_to_vmem [thread:$0]  %s51_s30, 256, %s53_s19, [#allocation6]  }
  0x14   :  { %s75_s2 = sshll.u32 %s2531_s22, 4  ;;  %s2532_s23 = smov 512   ;;  %s76_s2 = int_to_ptr.vmem [resolvable:$true] %s75_s2 }
  0x15   :  { %s2533_s24 = smov 32   ;;  %s100_s27 = sshll.u32 %s3478_s8, 4  ;;  %s101_s27 = int_to_ptr.hbm [resolvable:$true] %s100_s27 }
  0x16   :  { %81 = dma.hbm_to_vmem [thread:$0]  %s74_s21, 65536, %s76_s2, [#allocation9], %s2532_s23, %s2532_s23, %s2533_s24  }
  0x17   :  { %s2534_s28 = smov [#allocation11]   ;;  %s125_s5 = sshll.u32 %s3482_s12, 4  ;;  %s126_s5 = int_to_ptr.hbm [resolvable:$true] %s125_s5 }
  0x18   :  { %s102_s29 = sshll.u32 %s2534_s28, 4  ;;  %s2535_s30 = smov [#allocation14]   ;;  %s103_s29 = int_to_ptr.vmem [resolvable:$true] %s102_s29 }
  0x19   :  { %105 = dma.hbm_to_vmem [thread:$0]  %s101_s27, 16, %s103_s29, [#allocation12]  }
  0x1a   :  { %s127_s19 = sshll.u32 %s2535_s30, 4  ;;  %s2536_s20 = smov 128   ;;  %s128_s19 = int_to_ptr.vmem [resolvable:$true] %s127_s19 }
  0x1b   :  { %s2537_s22 = smov 8   ;;  %s3494_s2 = sld [smem:[#allocation32_spill]] }
  0x1c   :  { %133 = dma.hbm_to_vmem [thread:$0]  %s126_s5, 512, %s128_s19, [#allocation15], %s2536_s20, %s2536_s20, %s2537_s22  }
  0x1d   :  { %s2538_s25 = smov [#allocation2]   ;;  %s63_s28 = sshll.u32 %s3474_s4, 4  ;;  %s64_s28 = int_to_ptr.hbm [resolvable:$true] %s63_s28 }
  0x1e   :  { %s41_s26 = sshll.u32 %s2538_s25, 4  ;;  %s2539_s29 = smov [#allocation7]   ;;  %s42_s26 = int_to_ptr.vmem [resolvable:$true] %s41_s26 }
  0x1f   :  { %s65_s0 = sshll.u32 %s2539_s29, 4  ;;  %s87_s5 = sshll.u32 %s3476_s6, 4  ;;  %s66_s0 = int_to_ptr.vmem [resolvable:$true] %s65_s0  ;;  %s88_s5 = int_to_ptr.hbm [resolvable:$true] %s87_s5 }
  0x20   :  { %68 = dma.hbm_to_vmem [thread:$0]  %s64_s28, 16, %s66_s0, [#allocation6]  }
  0x21   :  { %s39_s23 = sshll.u32 %s3494_s2, 4  ;;  %s115_s21 = sshll.u32 %s3481_s11, 4  ;;  %s40_s23 = int_to_ptr.hbm [resolvable:$true] %s39_s23  ;;  %s116_s21 = int_to_ptr.hbm [resolvable:$true] %s115_s21 }
  0x22   :  { %44 = dma.hbm_to_vmem [thread:$0]  %s40_s23, 32, %s42_s26, [#allocation3]  }
  0x23   :  { %s2540_s2 = smov [#allocation10]   ;;  %s2541_s4 = smov [#allocation13]  }
  0x24   :  { %s89_s25 = sshll.u32 %s2540_s2, 4  ;;  %s117_s23 = sshll.u32 %s2541_s4, 4  ;;  %s90_s25 = int_to_ptr.vmem [resolvable:$true] %s89_s25  ;;  %s118_s23 = int_to_ptr.vmem [resolvable:$true] %s117_s23 }
  0x25   :  { %92 = dma.hbm_to_vmem [thread:$0]  %s88_s5, 64, %s90_s25, [#allocation9]  }
  0x26   :  { %s139_s27 = sshll.u32 %s3483_s13, 4  ;;  %s152_s29 = sshll.u32 %s3485_s15, 4  ;;  %s140_s27 = int_to_ptr.hbm [resolvable:$true] %s139_s27  ;;  %s153_s29 = int_to_ptr.hbm [resolvable:$true] %s152_s29 }
  0x27   :  { %120 = dma.hbm_to_vmem [thread:$0]  %s116_s21, 16, %s118_s23, [#allocation12]  }
  0x28   :  { %s2542_s0 = smov [#allocation16]   ;;  %s2543_s1 = smov [#allocation17]  }
  0x29   :  { %s141_s11 = sshll.u32 %s2542_s0, 4  ;;  %s154_s30 = sshll.u32 %s2543_s1, 4  ;;  %s142_s11 = int_to_ptr.vmem [resolvable:$true] %s141_s11  ;;  %s155_s30 = int_to_ptr.vmem [resolvable:$true] %s154_s30 }
  0x2a   :  { %144 = dma.hbm_to_vmem [thread:$0]  %s140_s27, 16, %s142_s11, [#allocation15]  }
  0x2b   :  { %157 = dma.hbm_to_vmem [thread:$0]  %s153_s29, 16, %s155_s30, [#allocation18]  }
  0x2c   :  { %2514 = dma.done.wait [#allocation3], 32  }
  0x2d   :  { %2515 = vsyncadd [#allocation3], 4294967264 }
  0x2e   :  { %2516 = dma.done.wait [#allocation6], 272  }
  0x2f   :  { %2517 = vsyncadd [#allocation6], 4294967024 }
  0x30   :  { %2518 = dma.done.wait [#allocation9], 65600  }
  0x31   :  { %2519 = vsyncadd [#allocation9], 4294901696 }
  0x32   :  { %2520 = dma.done.wait [#allocation12], 32  }
  0x33   :  { %2521 = vsyncadd [#allocation12], 4294967264 }
  0x34   :  { %2522 = dma.done.wait [#allocation15], 528  }
  0x35   :  { %2523 = vsyncadd [#allocation15], 4294966768 }
  0x36   :  { %2524 = dma.done.wait [#allocation18], 16  }
  0x37   :  { %2525 = vsyncadd [#allocation18], 4294967280  ;;  %v2544_v0 = vmov 0   ;;  %v323_v1 = vld [vmem:[#allocation8 + $0x1e0] sm:$0xff]  ;;  %s3495_s5 = sld [smem:[#allocation31_spill]]  ;;  %v2686_v28 = vld [vmem:[#allocation5] sm:$0xff] }
  0x38   :  { %2180 = vset.pattern.permute.xlu0 %v2544_v0  ;;  %v319_v3 = vld [vmem:[#allocation8 + $0x1c0] sm:$0xff]  ;;  %806 = vmatpush.msra.mxu1 %v323_v1  ;;  %787 = vst [vmem:[#allocation1] ss:$4 sm:$0xff] %v2686_v28  ;;  %v220_v56 = vld [vmem:[%s3473_s3 + $0x30] sm:$0xff]  ;;  %v219_v60 = vld [vmem:[%s3473_s3 + $0x28] sm:$0xff]  ;;  %vm1778_vm0 = vcmask 58368  }
  0x39   :  { %v387_v4 = vld [vmem:[#allocation8 + $0x3e0] sm:$0xff]  ;;  %vm226_vm1 = vcmask 523264   ;;  %vm258_vm4 = vcmask 261120   ;;  %vm1967_vm5 = vcmask 1041409   ;;  %vm1457_vm6 = vcmask 1041408   ;;  %s2118_s15 = sshll.u32 %s3487_s17, 4  ;;  %s2119_s15 = int_to_ptr.hbm [resolvable:$true] %s2118_s15 }
  0x3a   :  { %v315_v5 = vld [vmem:[#allocation8 + $0x1a0] sm:$0xff]  ;;  %826 = vmatpush.msra.mxu2 %v387_v4  ;;  %807 = vmatpush.msra.mxu1 %v319_v3  ;;  %vm1459_vm7 = vcmask 1045508   ;;  %vm1461_vm8 = vcmask 1043456   ;;  %vm1980_vm9 = vcmask 785408   ;;  %s2548_s8 = smov [#allocation19]   ;;  %s2549_s2 = smov 96  }
  0x3b   :  { %v383_v6 = vld [vmem:[#allocation8 + $0x3c0] sm:$0xff]  ;;  %s2102_s21 = sshll.u32 %s2548_s8, 4  ;;  %s2550_s17 = smov [#allocation22]   ;;  %vm2095_vm10 = vcmask 850944   ;;  %s2103_s21 = int_to_ptr.vmem [resolvable:$true] %s2102_s21 }
  0x3c   :  { %v379_v7 = vld [vmem:[#allocation8 + $0x3a0] sm:$0xff]  ;;  %827 = vmatpush.msra.mxu2 %v383_v6  ;;  %808 = vmatpush.msra.mxu1 %v315_v5  ;;  %s2127_s25 = sshll.u32 %s2550_s17, 4  ;;  %s2128_s25 = int_to_ptr.vmem [resolvable:$true] %s2127_s25 }
  0x3d   :  { %v198_v2 = vld [vmem:[%s3495_s5] sm:$0xff]  ;;  %v199_v11 = vld [vmem:[%s3495_s5 + $0x8] sm:$0xff]  ;;  %v221_v52 = vld [vmem:[%s3473_s3 + $0x38] sm:$0xff] }
  0x3e   :  { %203 = vperm.xlu0 %2180, %v198_v2   ;;  %v311_v8 = vld [vmem:[#allocation8 + $0x180] sm:$0xff]  ;;  %828 = vmatpush.msra.mxu2 %v379_v7 }
  0x3f   :  { %v375_v9 = vld [vmem:[#allocation8 + $0x380] sm:$0xff]  ;;  %809 = vmatpush.msra.mxu1 %v311_v8  ;;  %v2692_v42 = vld.sshfl [vmem:[#allocation1 + $0x8] sm:$0xff pattern:$0x73625140]  ;;  %241 = vmatpush.msra.mxu0 %v221_v52  ;;  %v216_v8 = vld [vmem:[%s3473_s3 + $0x10] sm:$0xff] }
  0x40   :  { %v307_v10 = vld [vmem:[#allocation8 + $0x160] sm:$0xff]  ;;  %829 = vmatpush.msra.mxu2 %v375_v9 }
  0x41   :  { %v371_v12 = vld [vmem:[#allocation8 + $0x360] sm:$0xff]  ;;  %810 = vmatpush.msra.mxu1 %v307_v10  ;;  %242 = vmatpush.msra.mxu0 %v220_v56 }
  0x42   :  { %v303_v13 = vld [vmem:[#allocation8 + $0x140] sm:$0xff]  ;;  %830 = vmatpush.msra.mxu2 %v371_v12  ;;  %v215_v12 = vld [vmem:[%s3473_s3 + $0x8] sm:$0xff] }
  0x43   :  { %v367_v14 = vld [vmem:[#allocation8 + $0x340] sm:$0xff]  ;;  %811 = vmatpush.msra.mxu1 %v303_v13  ;;  %243 = vmatpush.msra.mxu0 %v219_v60 }
  0x44   :  { %v299_v15 = vld [vmem:[#allocation8 + $0x120] sm:$0xff]  ;;  %831 = vmatpush.msra.mxu2 %v367_v14 }
  0x45   :  { %v363_v16 = vld [vmem:[#allocation8 + $0x320] sm:$0xff]  ;;  %812 = vmatpush.msra.mxu1 %v299_v15 }
  0x46   :  { %206 = vperm.xlu0 %2180, %v199_v11   ;;  %v295_v17 = vld [vmem:[#allocation8 + $0x100] sm:$0xff]  ;;  %832 = vmatpush.msra.mxu2 %v363_v16 }
  0x47   :  { %v359_v18 = vld [vmem:[#allocation8 + $0x300] sm:$0xff]  ;;  %813 = vmatpush.msra.mxu1 %v295_v17 }
  0x48   :  { %v291_v19 = vld [vmem:[#allocation8 + $0xe0] sm:$0xff]  ;;  %833 = vmatpush.msra.mxu2 %v359_v18 }
  0x49   :  { %v355_v20 = vld [vmem:[#allocation8 + $0x2e0] sm:$0xff]  ;;  %814 = vmatpush.msra.mxu1 %v291_v19 }
  0x4a   :  { %v287_v21 = vld [vmem:[#allocation8 + $0xc0] sm:$0xff]  ;;  %834 = vmatpush.msra.mxu2 %v355_v20  ;;  %v2719_v20 = vld [vmem:[#allocation5 + $0x8] sm:$0xff] }
  0x4b   :  { %v351_v22 = vld [vmem:[#allocation8 + $0x2c0] sm:$0xff]  ;;  %815 = vmatpush.msra.mxu1 %v287_v21  ;;  %789 = vst [vmem:[#allocation1 + $0x20] ss:$4 sm:$0xff] %v2719_v20 }
  0x4c   :  { %v283_v23 = vld [vmem:[#allocation8 + $0xa0] sm:$0xff]  ;;  %835 = vmatpush.msra.mxu2 %v351_v22 }
  0x4d   :  { %v347_v24 = vld [vmem:[#allocation8 + $0x2a0] sm:$0xff]  ;;  %816 = vmatpush.msra.mxu1 %v283_v23 }
  0x4e   :  { %v279_v25 = vld [vmem:[#allocation8 + $0x80] sm:$0xff]  ;;  %836 = vmatpush.msra.mxu2 %v347_v24 }
  0x4f   :  { %v343_v26 = vld [vmem:[#allocation8 + $0x280] sm:$0xff]  ;;  %817 = vmatpush.msra.mxu1 %v279_v25 }
  0x50   :  { %v275_v27 = vld [vmem:[#allocation8 + $0x60] sm:$0xff]  ;;  %837 = vmatpush.msra.mxu2 %v343_v26 }
  0x51   :  { %v339_v29 = vld [vmem:[#allocation8 + $0x260] sm:$0xff]  ;;  %818 = vmatpush.msra.mxu1 %v275_v27 }
  0x52   :  { %v271_v30 = vld [vmem:[#allocation8 + $0x40] sm:$0xff]  ;;  %838 = vmatpush.msra.mxu2 %v339_v29 }
  0x53   :  { %v335_v31 = vld [vmem:[#allocation8 + $0x240] sm:$0xff]  ;;  %819 = vmatpush.msra.mxu1 %v271_v30 }
  0x54   :  { %v267_v32 = vld [vmem:[#allocation8 + $0x20] sm:$0xff]  ;;  %839 = vmatpush.msra.mxu2 %v335_v31 }
  0x55   :  { %v331_v33 = vld [vmem:[#allocation8 + $0x220] sm:$0xff]  ;;  %820 = vmatpush.msra.mxu1 %v267_v32 }
  0x56   :  { %v263_v34 = vld [vmem:[#allocation8] sm:$0xff]  ;;  %840 = vmatpush.msra.mxu2 %v331_v33  ;;  %v324_v33 = vld [vmem:[#allocation8 + $0x1e8] sm:$0xff] }
  0x57   :  { %v579_v35 = vld [vmem:[#allocation8 + $0x9e0] sm:$0xff]  ;;  %821 = vmatpush.msra.mxu1 %v263_v34 }
  0x58   :  { %v327_v36 = vld [vmem:[#allocation8 + $0x200] sm:$0xff] }
  0x59   :  { %v643_v37 = vld [vmem:[#allocation8 + $0xbe0] sm:$0xff]  ;;  %886 = vmatpush.msrb.mxu1 %v579_v35  ;;  %841 = vmatpush.msra.mxu2 %v327_v36  ;;  %v388_v35 = vld [vmem:[#allocation8 + $0x3e8] sm:$0xff] }
  0x5a   :  { %v2689_v38 = vld.sshfl [vmem:[#allocation1] sm:$0xff pattern:$0x73625140]  ;;  %842 = vmatmul.f32.vlgmr.msra.gmra.mxu2 %v2692_v42  ;;  %v217_v4 = vld [vmem:[%s3473_s3 + $0x18] sm:$0xff] }
  0x5b   :  { %v575_v39 = vld [vmem:[#allocation8 + $0x9c0] sm:$0xff]  ;;  %906 = vmatpush.msrb.mxu2 %v643_v37  ;;  %822 = vmatmul.f32.vlgmr.msra.gmra.mxu1 %v2689_v38  ;;  %v320_v36 = vld [vmem:[#allocation8 + $0x1c8] sm:$0xff] }
  0x5c   :  { %v639_v40 = vld [vmem:[#allocation8 + $0xbc0] sm:$0xff]  ;;  %887 = vmatpush.msrb.mxu1 %v575_v39 }
  0x5d   :  { %v571_v41 = vld [vmem:[#allocation8 + $0x9a0] sm:$0xff]  ;;  %907 = vmatpush.msrb.mxu2 %v639_v40  ;;  %v384_v40 = vld [vmem:[#allocation8 + $0x3c8] sm:$0xff] }
  0x5e   :  { %v451_v43 = vld [vmem:[#allocation8 + $0x5e0] sm:$0xff]  ;;  %888 = vmatpush.msrb.mxu1 %v571_v41 }
  0x5f   :  { %v635_v44 = vld [vmem:[#allocation8 + $0xba0] sm:$0xff]  ;;  %846 = vmatpush.msra.mxu3 %v451_v43  ;;  %v316_v43 = vld [vmem:[#allocation8 + $0x1a8] sm:$0xff] }
  0x60   :  { %v567_v45 = vld [vmem:[#allocation8 + $0x980] sm:$0xff]  ;;  %908 = vmatpush.msrb.mxu2 %v635_v44 }
  0x61   :  { %v447_v46 = vld [vmem:[#allocation8 + $0x5c0] sm:$0xff]  ;;  %889 = vmatpush.msrb.mxu1 %v567_v45  ;;  %v380_v45 = vld [vmem:[#allocation8 + $0x3a8] sm:$0xff] }
  0x62   :  { %v631_v47 = vld [vmem:[#allocation8 + $0xb80] sm:$0xff]  ;;  %847 = vmatpush.msra.mxu3 %v447_v46 }
  0x63   :  { %v563_v48 = vld [vmem:[#allocation8 + $0x960] sm:$0xff]  ;;  %909 = vmatpush.msrb.mxu2 %v631_v47  ;;  %v312_v47 = vld [vmem:[#allocation8 + $0x188] sm:$0xff] }
  0x64   :  { %v443_v49 = vld [vmem:[#allocation8 + $0x5a0] sm:$0xff]  ;;  %890 = vmatpush.msrb.mxu1 %v563_v48  ;;  %v2725_v48 = vld.sshfl [vmem:[#allocation1 + $0x28] sm:$0xff pattern:$0x73625140] }
  0x65   :  { %v627_v50 = vld [vmem:[#allocation8 + $0xb60] sm:$0xff]  ;;  %848 = vmatpush.msra.mxu3 %v443_v49  ;;  %v376_v49 = vld [vmem:[#allocation8 + $0x388] sm:$0xff] }
  0x66   :  { %v559_v51 = vld [vmem:[#allocation8 + $0x940] sm:$0xff]  ;;  %910 = vmatpush.msrb.mxu2 %v627_v50 }
  0x67   :  { %v439_v53 = vld [vmem:[#allocation8 + $0x580] sm:$0xff]  ;;  %891 = vmatpush.msrb.mxu1 %v559_v51  ;;  %v308_v51 = vld [vmem:[#allocation8 + $0x168] sm:$0xff] }
  0x68   :  { %v623_v54 = vld [vmem:[#allocation8 + $0xb40] sm:$0xff]  ;;  %849 = vmatpush.msra.mxu3 %v439_v53  ;;  %v372_v53 = vld [vmem:[#allocation8 + $0x368] sm:$0xff] }
  0x69   :  { %v555_v55 = vld [vmem:[#allocation8 + $0x920] sm:$0xff]  ;;  %911 = vmatpush.msrb.mxu2 %v623_v54 }
  0x6a   :  { %v435_v57 = vld [vmem:[#allocation8 + $0x560] sm:$0xff]  ;;  %892 = vmatpush.msrb.mxu1 %v555_v55  ;;  %v304_v55 = vld [vmem:[#allocation8 + $0x148] sm:$0xff] }
  0x6b   :  { %v619_v58 = vld [vmem:[#allocation8 + $0xb20] sm:$0xff]  ;;  %850 = vmatpush.msra.mxu3 %v435_v57  ;;  %v368_v57 = vld [vmem:[#allocation8 + $0x348] sm:$0xff] }
  0x6c   :  { %v551_v59 = vld [vmem:[#allocation8 + $0x900] sm:$0xff]  ;;  %912 = vmatpush.msrb.mxu2 %v619_v58 }
  0x6d   :  { %v431_v61 = vld [vmem:[#allocation8 + $0x540] sm:$0xff]  ;;  %893 = vmatpush.msrb.mxu1 %v551_v59  ;;  %v300_v59 = vld [vmem:[#allocation8 + $0x128] sm:$0xff] }
  0x6e   :  { %v615_v62 = vld [vmem:[#allocation8 + $0xb00] sm:$0xff]  ;;  %851 = vmatpush.msra.mxu3 %v431_v61  ;;  %v364_v61 = vld [vmem:[#allocation8 + $0x328] sm:$0xff] }
  0x6f   :  { %v547_v63 = vld [vmem:[#allocation8 + $0x8e0] sm:$0xff]  ;;  %913 = vmatpush.msrb.mxu2 %v615_v62 }
  0x70   :  { %v218_v0 = vld [vmem:[%s3473_s3 + $0x20] sm:$0xff]  ;;  %894 = vmatpush.msrb.mxu1 %v547_v63 }
  0x71   :  { %v427_v1 = vld [vmem:[#allocation8 + $0x520] sm:$0xff]  ;;  %244 = vmatpush.msra.mxu0 %v218_v0  ;;  %v296_v63 = vld [vmem:[#allocation8 + $0x108] sm:$0xff] }
  0x72   :  { %v611_v2 = vld [vmem:[#allocation8 + $0xae0] sm:$0xff]  ;;  %852 = vmatpush.msra.mxu3 %v427_v1  ;;  %v360_v1 = vld [vmem:[#allocation8 + $0x308] sm:$0xff] }
  0x73   :  { %v543_v3 = vld [vmem:[#allocation8 + $0x8c0] sm:$0xff]  ;;  %245 = vmatpush.msra.mxu0 %v217_v4  ;;  %914 = vmatpush.msrb.mxu2 %v611_v2 }
  0x74   :  { %v423_v5 = vld [vmem:[#allocation8 + $0x500] sm:$0xff]  ;;  %895 = vmatpush.msrb.mxu1 %v543_v3  ;;  %v292_v3 = vld [vmem:[#allocation8 + $0xe8] sm:$0xff] }
  0x75   :  { %v607_v6 = vld [vmem:[#allocation8 + $0xac0] sm:$0xff]  ;;  %853 = vmatpush.msra.mxu3 %v423_v5  ;;  %246 = vmatpush.msra.mxu0 %v216_v8  ;;  %v356_v5 = vld [vmem:[#allocation8 + $0x2e8] sm:$0xff] }
  0x76   :  { %v539_v7 = vld [vmem:[#allocation8 + $0x8a0] sm:$0xff]  ;;  %915 = vmatpush.msrb.mxu2 %v607_v6 }
  0x77   :  { %v419_v9 = vld [vmem:[#allocation8 + $0x4e0] sm:$0xff]  ;;  %896 = vmatpush.msrb.mxu1 %v539_v7  ;;  %247 = vmatpush.msra.mxu0 %v215_v12  ;;  %v288_v7 = vld [vmem:[#allocation8 + $0xc8] sm:$0xff] }
  0x78   :  { %v603_v10 = vld [vmem:[#allocation8 + $0xaa0] sm:$0xff]  ;;  %854 = vmatpush.msra.mxu3 %v419_v9  ;;  %v352_v9 = vld [vmem:[#allocation8 + $0x2c8] sm:$0xff] }
  0x79   :  { %v535_v11 = vld [vmem:[#allocation8 + $0x880] sm:$0xff]  ;;  %916 = vmatpush.msrb.mxu2 %v603_v10 }
  0x7a   :  { %v415_v13 = vld [vmem:[#allocation8 + $0x4c0] sm:$0xff]  ;;  %897 = vmatpush.msrb.mxu1 %v535_v11  ;;  %v284_v11 = vld [vmem:[#allocation8 + $0xa8] sm:$0xff] }
  0x7b   :  { %v531_v14 = vld [vmem:[#allocation8 + $0x860] sm:$0xff]  ;;  %855 = vmatpush.msra.mxu3 %v415_v13  ;;  %v348_v13 = vld [vmem:[#allocation8 + $0x2a8] sm:$0xff] }
  0x7c   :  { %v599_v15 = vld [vmem:[#allocation8 + $0xa80] sm:$0xff]  ;;  %898 = vmatpush.msrb.mxu1 %v531_v14 }
  0x7d   :  { %v214_v16 = vld [vmem:[%s3473_s3] sm:$0xff]  ;;  %917 = vmatpush.msrb.mxu2 %v599_v15 }
  0x7e   :  { %v411_v17 = vld [vmem:[#allocation8 + $0x4a0] sm:$0xff]  ;;  %248 = vmatpush.msra.mxu0 %v214_v16  ;;  %v280_v15 = vld [vmem:[#allocation8 + $0x88] sm:$0xff] }
  0x7f   :  { %v515_v18 = vld [vmem:[#allocation8 + $0x7e0] sm:$0xff]  ;;  %856 = vmatpush.msra.mxu3 %v411_v17  ;;  %v344_v17 = vld [vmem:[#allocation8 + $0x288] sm:$0xff] }
  0x80   :  { %v595_v19 = vld [vmem:[#allocation8 + $0xa60] sm:$0xff]  ;;  %866 = vmatpush.msrb.mxu0 %v515_v18 }
  0x81   :  { %v527_v21 = vld [vmem:[#allocation8 + $0x840] sm:$0xff]  ;;  %918 = vmatpush.msrb.mxu2 %v595_v19  ;;  %v276_v19 = vld [vmem:[#allocation8 + $0x68] sm:$0xff] }
  0x82   :  { %v407_v22 = vld [vmem:[#allocation8 + $0x480] sm:$0xff]  ;;  %899 = vmatpush.msrb.mxu1 %v527_v21 }
  0x83   :  { %v511_v23 = vld [vmem:[#allocation8 + $0x7c0] sm:$0xff]  ;;  %857 = vmatpush.msra.mxu3 %v407_v22  ;;  %v340_v22 = vld [vmem:[#allocation8 + $0x268] sm:$0xff] }
  0x84   :  { %v591_v24 = vld [vmem:[#allocation8 + $0xa40] sm:$0xff]  ;;  %867 = vmatpush.msrb.mxu0 %v511_v23 }
  0x85   :  { %v523_v25 = vld [vmem:[#allocation8 + $0x820] sm:$0xff]  ;;  %919 = vmatpush.msrb.mxu2 %v591_v24  ;;  %v272_v24 = vld [vmem:[#allocation8 + $0x48] sm:$0xff] }
  0x86   :  { %v403_v26 = vld [vmem:[#allocation8 + $0x460] sm:$0xff]  ;;  %900 = vmatpush.msrb.mxu1 %v523_v25 }
  0x87   :  { %v507_v27 = vld [vmem:[#allocation8 + $0x7a0] sm:$0xff]  ;;  %858 = vmatpush.msra.mxu3 %v403_v26  ;;  %v336_v26 = vld [vmem:[#allocation8 + $0x248] sm:$0xff] }
  0x88   :  { %v587_v29 = vld [vmem:[#allocation8 + $0xa20] sm:$0xff]  ;;  %868 = vmatpush.msrb.mxu0 %v507_v27  ;;  %v200_v27 = vlaneseq }
  0x89   :  { %v519_v30 = vld [vmem:[#allocation8 + $0x800] sm:$0xff]  ;;  %920 = vmatpush.msrb.mxu2 %v587_v29 }
  0x8a   :  { %v399_v31 = vld [vmem:[#allocation8 + $0x440] sm:$0xff]  ;;  %901 = vmatpush.msrb.mxu1 %v519_v30  ;;  %v268_v30 = vld [vmem:[#allocation8 + $0x28] sm:$0xff] }
  0x8b   :  { %v503_v32 = vld [vmem:[#allocation8 + $0x780] sm:$0xff]  ;;  %859 = vmatpush.msra.mxu3 %v399_v31  ;;  %v332_v31 = vld [vmem:[#allocation8 + $0x228] sm:$0xff] }
  0x8c   :  { %v583_v34 = vld [vmem:[#allocation8 + $0xa00] sm:$0xff]  ;;  %869 = vmatpush.msrb.mxu0 %v503_v32  ;;  %966 = vmatpush.msra.mxu1 %v324_v33  ;;  %v1785_v33 = vshrl.u32 %v200_v27, 7 }
  0x8d   :  { %v2722_v37 = vld.sshfl [vmem:[#allocation1 + $0x20] sm:$0xff pattern:$0x73625140]  ;;  %921 = vmatpush.msrb.mxu2 %v583_v34 }
  0x8e   :  { %v395_v39 = vld [vmem:[#allocation8 + $0x420] sm:$0xff]  ;;  %902 = vmatmul.f32.vlgmr.msrb.gmra.mxu1 %v2722_v37  ;;  %922 = vmatmul.f32.vlgmr.msrb.gmra.mxu2 %v2725_v48  ;;  %v264_v34 = vld [vmem:[#allocation8 + $0x8] sm:$0xff] }
  0x8f   :  { %v499_v41 = vld [vmem:[#allocation8 + $0x760] sm:$0xff]  ;;  %986 = vmatpush.msra.mxu2 %v388_v35  ;;  %967 = vmatpush.msra.mxu1 %v320_v36  ;;  %v580_v35 = vld [vmem:[#allocation8 + $0x9e8] sm:$0xff] }
  0x90   :  { %v391_v44 = vld [vmem:[#allocation8 + $0x400] sm:$0xff]  ;;  %860 = vmatpush.msra.mxu3 %v395_v39  ;;  %870 = vmatpush.msrb.mxu0 %v499_v41  ;;  %v328_v36 = vld [vmem:[#allocation8 + $0x208] sm:$0xff] }
  0x91   :  { %v495_v46 = vld [vmem:[#allocation8 + $0x740] sm:$0xff]  ;;  %987 = vmatpush.msra.mxu2 %v384_v40  ;;  %968 = vmatpush.msra.mxu1 %v316_v43  ;;  %v644_v39 = vld [vmem:[#allocation8 + $0xbe8] sm:$0xff] }
  0x92   :  { %861 = vmatpush.msra.mxu3 %v391_v44  ;;  %v707_v50 = vld [vmem:[#allocation8 + $0xde0] sm:$0xff]  ;;  %871 = vmatpush.msrb.mxu0 %v495_v46  ;;  %v576_v41 = vld [vmem:[#allocation8 + $0x9c8] sm:$0xff] }
  0x93   :  { %988 = vmatpush.msra.mxu2 %v380_v45  ;;  %v491_v52 = vld [vmem:[#allocation8 + $0x720] sm:$0xff]  ;;  %969 = vmatpush.msra.mxu1 %v312_v47  ;;  %v640_v43 = vld [vmem:[#allocation8 + $0xbc8] sm:$0xff] }
  0x94   :  { %v703_v54 = vld [vmem:[#allocation8 + $0xdc0] sm:$0xff]  ;;  %926 = vmatpush.msrb.mxu3 %v707_v50  ;;  %872 = vmatpush.msrb.mxu0 %v491_v52  ;;  %v572_v45 = vld [vmem:[#allocation8 + $0x9a8] sm:$0xff] }
  0x95   :  { %989 = vmatpush.msra.mxu2 %v376_v49  ;;  %v487_v56 = vld [vmem:[#allocation8 + $0x700] sm:$0xff]  ;;  %970 = vmatpush.msra.mxu1 %v308_v51  ;;  %v636_v46 = vld [vmem:[#allocation8 + $0xba8] sm:$0xff]  ;;  %v2730_v51 = vld.sshfl [vmem:[#allocation1 + $0x10] sm:$0xff pattern:$0x73625140] }
  0x96   :  { %v699_v58 = vld [vmem:[#allocation8 + $0xda0] sm:$0xff]  ;;  %927 = vmatpush.msrb.mxu3 %v703_v54  ;;  %873 = vmatpush.msrb.mxu0 %v487_v56  ;;  %v1777_v47 = vld [vmem:[#allocation2] sm:$0x3] }
  0x97   :  { %990 = vmatpush.msra.mxu2 %v372_v53  ;;  %v483_v60 = vld [vmem:[#allocation8 + $0x6e0] sm:$0xff]  ;;  %971 = vmatpush.msra.mxu1 %v304_v55  ;;  %v568_v49 = vld [vmem:[#allocation8 + $0x988] sm:$0xff]  ;;  %v1790_v52 = vperm.slane %v1777_v47, 1 }
  0x98   :  { %v695_v62 = vld [vmem:[#allocation8 + $0xd80] sm:$0xff]  ;;  %928 = vmatpush.msrb.mxu3 %v699_v58  ;;  %874 = vmatpush.msrb.mxu0 %v483_v60  ;;  %v632_v53 = vld [vmem:[#allocation8 + $0xb88] sm:$0xff] }
  0x99   :  { %991 = vmatpush.msra.mxu2 %v368_v57  ;;  %v479_v0 = vld [vmem:[#allocation8 + $0x6c0] sm:$0xff]  ;;  %972 = vmatpush.msra.mxu1 %v300_v59  ;;  %v564_v54 = vld [vmem:[#allocation8 + $0x968] sm:$0xff] }
  0x9a   :  { %v691_v2 = vld [vmem:[#allocation8 + $0xd60] sm:$0xff]  ;;  %929 = vmatpush.msrb.mxu3 %v695_v62  ;;  %875 = vmatpush.msrb.mxu0 %v479_v0  ;;  %v628_v56 = vld [vmem:[#allocation8 + $0xb68] sm:$0xff] }
  0x9b   :  { %992 = vmatpush.msra.mxu2 %v364_v61  ;;  %v475_v4 = vld [vmem:[#allocation8 + $0x6a0] sm:$0xff]  ;;  %973 = vmatpush.msra.mxu1 %v296_v63  ;;  %v452_v57 = vld [vmem:[#allocation8 + $0x5e8] sm:$0xff] }
  0x9c   :  { %v687_v6 = vld [vmem:[#allocation8 + $0xd40] sm:$0xff]  ;;  %930 = vmatpush.msrb.mxu3 %v691_v2  ;;  %876 = vmatpush.msrb.mxu0 %v475_v4  ;;  %v560_v58 = vld [vmem:[#allocation8 + $0x948] sm:$0xff] }
  0x9d   :  { %993 = vmatpush.msra.mxu2 %v360_v1  ;;  %v471_v8 = vld [vmem:[#allocation8 + $0x680] sm:$0xff]  ;;  %974 = vmatpush.msra.mxu1 %v292_v3  ;;  %v624_v59 = vld [vmem:[#allocation8 + $0xb48] sm:$0xff]  ;;  %v1783_v3 = vperm.slane %v1777_v47, 0 }
  0x9e   :  { %v683_v10 = vld [vmem:[#allocation8 + $0xd20] sm:$0xff]  ;;  %931 = vmatpush.msrb.mxu3 %v687_v6  ;;  %877 = vmatpush.msrb.mxu0 %v471_v8  ;;  %v448_v60 = vld [vmem:[#allocation8 + $0x5c8] sm:$0xff] }
  0x9f   :  { %994 = vmatpush.msra.mxu2 %v356_v5  ;;  %v467_v12 = vld [vmem:[#allocation8 + $0x660] sm:$0xff]  ;;  %975 = vmatpush.msra.mxu1 %v288_v7  ;;  %v556_v61 = vld [vmem:[#allocation8 + $0x928] sm:$0xff] }
  0xa0   :  { %v679_v14 = vld [vmem:[#allocation8 + $0xd00] sm:$0xff]  ;;  %932 = vmatpush.msrb.mxu3 %v683_v10  ;;  %878 = vmatpush.msrb.mxu0 %v467_v12  ;;  %v620_v62 = vld [vmem:[#allocation8 + $0xb28] sm:$0xff]  ;;  %v201_v12 = vand.u32 127, %v200_v27 }
  0xa1   :  { %995 = vmatpush.msra.mxu2 %v352_v9  ;;  %v463_v16 = vld [vmem:[#allocation8 + $0x640] sm:$0xff]  ;;  %976 = vmatpush.msra.mxu1 %v284_v11  ;;  %v444_v63 = vld [vmem:[#allocation8 + $0x5a8] sm:$0xff]  ;;  %v1779_v11 = vsel %vm1778_vm0, %v1777_v47, 0.0  ;;  %v389_v47 = vld [vmem:[#allocation8 + $0x3f0] sm:$0xff] }
  0xa2   :  { %v675_v18 = vld [vmem:[#allocation8 + $0xce0] sm:$0xff]  ;;  %933 = vmatpush.msrb.mxu3 %v679_v14  ;;  %879 = vmatpush.msrb.mxu0 %v463_v16  ;;  %v552_v0 = vld [vmem:[#allocation8 + $0x908] sm:$0xff] }
  0xa3   :  { %996 = vmatpush.msra.mxu2 %v348_v13  ;;  %v459_v21 = vld [vmem:[#allocation8 + $0x620] sm:$0xff]  ;;  %977 = vmatpush.msra.mxu1 %v280_v15  ;;  %v616_v1 = vld [vmem:[#allocation8 + $0xb08] sm:$0xff] }
  0xa4   :  { %v671_v23 = vld [vmem:[#allocation8 + $0xcc0] sm:$0xff]  ;;  %934 = vmatpush.msrb.mxu3 %v675_v18  ;;  %880 = vmatpush.msrb.mxu0 %v459_v21  ;;  %v440_v2 = vld [vmem:[#allocation8 + $0x588] sm:$0xff] }
  0xa5   :  { %997 = vmatpush.msra.mxu2 %v344_v17  ;;  %v455_v25 = vld [vmem:[#allocation8 + $0x600] sm:$0xff]  ;;  %978 = vmatpush.msra.mxu1 %v276_v19  ;;  %v548_v4 = vld [vmem:[#allocation8 + $0x8e8] sm:$0xff] }
  0xa6   :  { %v667_v29 = vld [vmem:[#allocation8 + $0xca0] sm:$0xff]  ;;  %935 = vmatpush.msrb.mxu3 %v671_v23  ;;  %881 = vmatpush.msrb.mxu0 %v455_v25  ;;  %v612_v5 = vld [vmem:[#allocation8 + $0xae8] sm:$0xff]  ;;  %v2545_v23 = vmov 0.0  }
  0xa7   :  { %998 = vmatpush.msra.mxu2 %v340_v22  ;;  %979 = vmatpush.msra.mxu1 %v272_v24  ;;  %v663_v32 = vld [vmem:[#allocation8 + $0xc80] sm:$0xff]  ;;  %v436_v6 = vld [vmem:[#allocation8 + $0x568] sm:$0xff] }
  0xa8   :  { %936 = vmatpush.msrb.mxu3 %v667_v29  ;;  %2181 = vset.pattern.permute.xlu1 %v1785_v33  ;;  %v659_v40 = vld [vmem:[#allocation8 + $0xc60] sm:$0xff]  ;;  %v544_v7 = vld [vmem:[#allocation8 + $0x8c8] sm:$0xff] }
  0xa9   :  { %999 = vmatpush.msra.mxu2 %v336_v26  ;;  %980 = vmatpush.msra.mxu1 %v268_v30  ;;  %v655_v44 = vld [vmem:[#allocation8 + $0xc40] sm:$0xff]  ;;  %v608_v8 = vld [vmem:[#allocation8 + $0xac8] sm:$0xff] }
  0xaa   :  { %937 = vmatpush.msrb.mxu3 %v663_v32  ;;  %2182 = vset.pattern.permute.xlu0 %v1785_v33  ;;  %v651_v50 = vld [vmem:[#allocation8 + $0xc20] sm:$0xff]  ;;  %v432_v9 = vld [vmem:[#allocation8 + $0x548] sm:$0xff] }
  0xab   :  { %1000 = vmatpush.msra.mxu2 %v332_v31  ;;  %981 = vmatpush.msra.mxu1 %v264_v34  ;;  %v647_v55 = vld [vmem:[#allocation8 + $0xc00] sm:$0xff]  ;;  %v540_v10 = vld [vmem:[#allocation8 + $0x8a8] sm:$0xff] }
  0xac   :  { %938 = vmatpush.msrb.mxu3 %v659_v40  ;;  %982 = vmatmul.f32.vlgmr.msra.gmra.mxu1 %v2689_v38  ;;  %v604_v13 = vld [vmem:[#allocation8 + $0xaa8] sm:$0xff]  ;;  %v771_v21 = vld [vmem:[#allocation8 + $0xfe0] sm:$0xff]  ;;  %v325_v40 = vld [vmem:[#allocation8 + $0x1f0] sm:$0xff] }
  0xad   :  { %1046 = vmatpush.msrb.mxu1 %v580_v35  ;;  %1001 = vmatpush.msra.mxu2 %v328_v36  ;;  %v428_v14 = vld [vmem:[#allocation8 + $0x528] sm:$0xff]  ;;  %v2735_v27 = vld.sshfl [vmem:[#allocation1 + $0x18] sm:$0xff pattern:$0x73625140] }
  0xae   :  { %1002 = vmatmul.f32.vlgmr.msra.gmra.mxu2 %v2692_v42  ;;  %939 = vmatpush.msrb.mxu3 %v655_v44  ;;  %v536_v15 = vld [vmem:[#allocation8 + $0x888] sm:$0xff]  ;;  %v767_v29 = vld [vmem:[#allocation8 + $0xfc0] sm:$0xff]  ;;  %1597 = vst [vmem:[#allocation1] ss:$4 sm:$0xff] %v2686_v28  ;;  %v321_v44 = vld [vmem:[#allocation8 + $0x1d0] sm:$0xff] }
  0xaf   :  { %1066 = vmatpush.msrb.mxu2 %v644_v39  ;;  %1047 = vmatpush.msrb.mxu1 %v576_v41  ;;  %v600_v16 = vld [vmem:[#allocation8 + $0xa88] sm:$0xff]  ;;  %v763_v33 = vld [vmem:[#allocation8 + $0xfa0] sm:$0xff]  ;;  %v2739_v36 = vld.sshfl [vmem:[#allocation1 + $0x30] sm:$0xff pattern:$0x73625140] }
  0xb0   :  { %862 = vmatmul.f32.vlgmr.msra.gmra.mxu3 %v2730_v51  ;;  %1795 = vperm.xlu1 %2181, %v1790_v52   ;;  %v424_v17 = vld [vmem:[#allocation8 + $0x508] sm:$0xff]  ;;  %v204_v18 = vpop.permute.xlu0 %203  ;;  %v759_v39 = vld [vmem:[#allocation8 + $0xf80] sm:$0xff]  ;;  %v317_v52 = vld [vmem:[#allocation8 + $0x1b0] sm:$0xff] }
  0xb1   :  { %1067 = vmatpush.msrb.mxu2 %v640_v43  ;;  %1048 = vmatpush.msrb.mxu1 %v572_v45  ;;  %v532_v19 = vld [vmem:[#allocation8 + $0x868] sm:$0xff]  ;;  %vm208_vm2 = vcmp.eq.s32.totalorder %v204_v18, %v201_v12  ;;  %v755_v43 = vld [vmem:[#allocation8 + $0xf60] sm:$0xff]  ;;  %v353_v18 = vld [vmem:[#allocation8 + $0x2d0] sm:$0xff] }
  0xb2   :  { %940 = vmatpush.msrb.mxu3 %v651_v50  ;;  %1780 = vadd.xlane.f32.xlu2 %v1779_v11  ;;  %v596_v22 = vld [vmem:[#allocation8 + $0xa68] sm:$0xff]  ;;  %v2153_v24 = vsel %vm208_vm2, 1.0, %v2545_v23  ;;  %v2742_v45 = vld.sshfl [vmem:[#allocation1 + $0x38] sm:$0xff pattern:$0x73625140] }
  0xb3   :  { %1068 = vmatpush.msrb.mxu2 %v636_v46  ;;  %1049 = vmatpush.msrb.mxu1 %v568_v49  ;;  %v528_v25 = vld [vmem:[#allocation8 + $0x848] sm:$0xff]  ;;  %1599 = vst [vmem:[#allocation1 + $0x20] ss:$4 sm:$0xff] %v2719_v20  ;;  %v751_v50 = vld [vmem:[#allocation8 + $0xf40] sm:$0xff]  ;;  %v309_v20 = vld [vmem:[#allocation8 + $0x170] sm:$0xff] }
  0xb4   :  { %941 = vmatpush.msrb.mxu3 %v647_v55  ;;  %v420_v26 = vld [vmem:[#allocation8 + $0x4e8] sm:$0xff]  ;;  %2155 = vmatmul.msk.f32.vlgmr.msra.gmra.mxu0 %vm226_vm1, %v2153_v24  ;;  %v747_v55 = vld [vmem:[#allocation8 + $0xf20] sm:$0xff] }
  0xb5   :  { %1069 = vmatpush.msrb.mxu2 %v632_v53  ;;  %1050 = vmatpush.msrb.mxu1 %v564_v54  ;;  %v592_v30 = vld [vmem:[#allocation8 + $0xa48] sm:$0xff]  ;;  %v385_v53 = vld [vmem:[#allocation8 + $0x3d0] sm:$0xff] }
  0xb6   :  { %1006 = vmatpush.msra.mxu3 %v452_v57  ;;  %946 = vmatpush.msra.mxu0 %v771_v21  ;;  %v524_v31 = vld [vmem:[#allocation8 + $0x828] sm:$0xff]  ;;  %v381_v57 = vld [vmem:[#allocation8 + $0x3b0] sm:$0xff]  ;;  %v715_v21 = vld [vmem:[#allocation8 + $0xe20] sm:$0xff] }
  0xb7   :  { %1070 = vmatpush.msrb.mxu2 %v628_v56  ;;  %1051 = vmatpush.msrb.mxu1 %v560_v58  ;;  %v416_v32 = vld [vmem:[#allocation8 + $0x4c8] sm:$0xff]  ;;  %v313_v56 = vld [vmem:[#allocation8 + $0x190] sm:$0xff] }
  0xb8   :  { %1007 = vmatpush.msra.mxu3 %v448_v60  ;;  %1788 = vperm.xlu1 %2181, %v1783_v3   ;;  %v588_v34 = vld [vmem:[#allocation8 + $0xa28] sm:$0xff]  ;;  %v207_v41 = vpop.permute.xlu0 %206  ;;  %v377_v60 = vld [vmem:[#allocation8 + $0x390] sm:$0xff] }
  0xb9   :  { %1071 = vmatpush.msrb.mxu2 %v624_v59  ;;  %1052 = vmatpush.msrb.mxu1 %v556_v61  ;;  %v520_v35 = vld [vmem:[#allocation8 + $0x808] sm:$0xff]  ;;  %vm209_vm3 = vcmp.eq.s32.totalorder %v207_v41, %v201_v12  ;;  %v743_v59 = vld [vmem:[#allocation8 + $0xf00] sm:$0xff]  ;;  %v369_v3 = vld [vmem:[#allocation8 + $0x350] sm:$0xff] }
  0xba   :  { %1008 = vmatpush.msra.mxu3 %v444_v63  ;;  %947 = vmatpush.msra.mxu0 %v767_v29  ;;  %v584_v28 = vld [vmem:[#allocation8 + $0xa08] sm:$0xff]  ;;  %v2154_v46 = vsel %vm209_vm3, 1.0, %v2545_v23  ;;  %v739_v61 = vld [vmem:[#allocation8 + $0xee0] sm:$0xff]  ;;  %v373_v63 = vld [vmem:[#allocation8 + $0x370] sm:$0xff] }
  0xbb   :  { %1072 = vmatpush.msrb.mxu2 %v620_v62  ;;  %1053 = vmatpush.msrb.mxu1 %v552_v0  ;;  %v412_v49 = vld [vmem:[#allocation8 + $0x4a8] sm:$0xff]  ;;  %v305_v62 = vld [vmem:[#allocation8 + $0x150] sm:$0xff]  ;;  %v723_v12 = vld [vmem:[#allocation8 + $0xe60] sm:$0xff] }
  0xbc   :  { %1009 = vmatpush.msra.mxu3 %v440_v2  ;;  %948 = vmatpush.msra.mxu0 %v763_v33  ;;  %v408_v54 = vld [vmem:[#allocation8 + $0x488] sm:$0xff]  ;;  %v301_v2 = vld [vmem:[#allocation8 + $0x130] sm:$0xff] }
  0xbd   :  { %1073 = vmatpush.msrb.mxu2 %v616_v1  ;;  %1054 = vmatpush.msrb.mxu1 %v548_v4  ;;  %v404_v58 = vld [vmem:[#allocation8 + $0x468] sm:$0xff]  ;;  %v735_v1 = vld [vmem:[#allocation8 + $0xec0] sm:$0xff]  ;;  %v349_v23 = vld [vmem:[#allocation8 + $0x2b0] sm:$0xff] }
  0xbe   :  { %1010 = vmatpush.msra.mxu3 %v436_v6  ;;  %949 = vmatpush.msra.mxu0 %v759_v39  ;;  %v400_v0 = vld [vmem:[#allocation8 + $0x448] sm:$0xff]  ;;  %v731_v4 = vld [vmem:[#allocation8 + $0xea0] sm:$0xff]  ;;  %v365_v6 = vld [vmem:[#allocation8 + $0x330] sm:$0xff] }
  0xbf   :  { %1074 = vmatpush.msrb.mxu2 %v612_v5  ;;  %1055 = vmatpush.msrb.mxu1 %v544_v7  ;;  %v297_v5 = vld [vmem:[#allocation8 + $0x110] sm:$0xff]  ;;  %v396_v7 = vld [vmem:[#allocation8 + $0x428] sm:$0xff] }
  0xc0   :  { %1011 = vmatpush.msra.mxu3 %v432_v9  ;;  %2156 = vmatmul.msk.f32.gmra.mxu0 %vm226_vm1, %v2154_v46  ;;  %v293_v9 = vld [vmem:[#allocation8 + $0xf0] sm:$0xff]  ;;  %v392_v11 = vld [vmem:[#allocation8 + $0x408] sm:$0xff] }
  0xc1   :  { %1075 = vmatpush.msrb.mxu2 %v608_v8  ;;  %1056 = vmatpush.msrb.mxu1 %v540_v10  ;;  %v727_v8 = vld [vmem:[#allocation8 + $0xe80] sm:$0xff]  ;;  %v361_v10 = vld [vmem:[#allocation8 + $0x310] sm:$0xff]  ;;  %v700_v24 = vld [vmem:[#allocation8 + $0xda8] sm:$0xff] }
  0xc2   :  { %1012 = vmatpush.msra.mxu3 %v428_v14  ;;  %950 = vmatpush.msra.mxu0 %v755_v43  ;;  %v357_v14 = vld [vmem:[#allocation8 + $0x2f0] sm:$0xff]  ;;  %v516_v29 = vld [vmem:[#allocation8 + $0x7e8] sm:$0xff] }
  0xc3   :  { %1076 = vmatpush.msrb.mxu2 %v604_v13  ;;  %1057 = vmatpush.msrb.mxu1 %v536_v15  ;;  %v289_v13 = vld [vmem:[#allocation8 + $0xd0] sm:$0xff]  ;;  %v708_v15 = vld [vmem:[#allocation8 + $0xde8] sm:$0xff] }
  0xc4   :  { %1013 = vmatpush.msra.mxu3 %v424_v17  ;;  %951 = vmatpush.msra.mxu0 %v751_v50  ;;  %v285_v17 = vld [vmem:[#allocation8 + $0xb0] sm:$0xff]  ;;  %v696_v41 = vld [vmem:[#allocation8 + $0xd88] sm:$0xff] }
  0xc5   :  { %1077 = vmatpush.msrb.mxu2 %v600_v16  ;;  %1058 = vmatpush.msrb.mxu1 %v532_v19  ;;  %v719_v16 = vld [vmem:[#allocation8 + $0xe40] sm:$0xff]  ;;  %v704_v19 = vld [vmem:[#allocation8 + $0xdc8] sm:$0xff]  ;;  %v341_v33 = vld [vmem:[#allocation8 + $0x270] sm:$0xff] }
  0xc6   :  { %1014 = vmatpush.msra.mxu3 %v420_v26  ;;  %952 = vmatpush.msra.mxu0 %v747_v55  ;;  %v277_v26 = vld [vmem:[#allocation8 + $0x70] sm:$0xff]  ;;  %v692_v46 = vld [vmem:[#allocation8 + $0xd68] sm:$0xff] }
  0xc7   :  { %1078 = vmatpush.msrb.mxu2 %v596_v22  ;;  %1059 = vmatpush.msrb.mxu1 %v528_v25  ;;  %v281_v22 = vld [vmem:[#allocation8 + $0x90] sm:$0xff]  ;;  %v711_v25 = vld [vmem:[#allocation8 + $0xe00] sm:$0xff] }
  0xc8   :  { %1015 = vmatpush.msra.mxu3 %v416_v32  ;;  %953 = vmatpush.msra.mxu0 %v743_v59  ;;  %v512_v32 = vld [vmem:[#allocation8 + $0x7c8] sm:$0xff]  ;;  %v337_v39 = vld [vmem:[#allocation8 + $0x250] sm:$0xff] }
  0xc9   :  { %1079 = vmatpush.msrb.mxu2 %v592_v30  ;;  %1060 = vmatpush.msrb.mxu1 %v524_v31  ;;  %v345_v30 = vld [vmem:[#allocation8 + $0x290] sm:$0xff] }
  0xca   :  { %942 = vmatmul.f32.vlgmr.msrb.gmra.mxu3 %v2739_v36  ;;  %882 = vmatmul.f32.vlgmr.msrb.gmra.mxu0 %v2735_v27  ;;  %v273_v31 = vld [vmem:[#allocation8 + $0x50] sm:$0xff] }
  0xcb   :  { %1080 = vmatpush.msrb.mxu2 %v588_v34  ;;  %1061 = vmatpush.msrb.mxu1 %v520_v35  ;;  %v269_v34 = vld [vmem:[#allocation8 + $0x30] sm:$0xff]  ;;  %v508_v35 = vld [vmem:[#allocation8 + $0x7a8] sm:$0xff] }
  0xcc   :  { %1016 = vmatpush.msra.mxu3 %v412_v49  ;;  %954 = vmatpush.msra.mxu0 %v739_v61  ;;  %v581_v43 = vld [vmem:[#allocation8 + $0x9f0] sm:$0xff] }
  0xcd   :  { %1126 = vmatpush.msra.mxu1 %v325_v40  ;;  %1081 = vmatpush.msrb.mxu2 %v584_v28  ;;  %v265_v40 = vld [vmem:[#allocation8 + $0x10] sm:$0xff]  ;;  %v504_v28 = vld [vmem:[#allocation8 + $0x788] sm:$0xff] }
  0xce   :  { %1017 = vmatpush.msra.mxu3 %v408_v54  ;;  %955 = vmatpush.msra.mxu0 %v735_v1  ;;  %v577_v49 = vld [vmem:[#allocation8 + $0x9d0] sm:$0xff] }
  0xcf   :  { %1127 = vmatpush.msra.mxu1 %v321_v44  ;;  %1146 = vmatpush.msra.mxu2 %v389_v47  ;;  %v333_v44 = vld [vmem:[#allocation8 + $0x230] sm:$0xff]  ;;  %v500_v47 = vld [vmem:[#allocation8 + $0x768] sm:$0xff] }
  0xd0   :  { %1018 = vmatpush.msra.mxu3 %v404_v58  ;;  %1062 = vmatmul.f32.vlgmr.msrb.gmra.mxu1 %v2722_v37  ;;  %v329_v50 = vld [vmem:[#allocation8 + $0x210] sm:$0xff] }
  0xd1   :  { %1128 = vmatpush.msra.mxu1 %v317_v52  ;;  %1147 = vmatpush.msra.mxu2 %v385_v53  ;;  %v688_v52 = vld [vmem:[#allocation8 + $0xd48] sm:$0xff]  ;;  %v573_v54 = vld [vmem:[#allocation8 + $0x9b0] sm:$0xff] }
  0xd2   :  { %1019 = vmatpush.msra.mxu3 %v400_v0  ;;  %956 = vmatpush.msra.mxu0 %v731_v4  ;;  %v496_v53 = vld [vmem:[#allocation8 + $0x748] sm:$0xff]  ;;  %v645_v55 = vld [vmem:[#allocation8 + $0xbf0] sm:$0xff] }
  0xd3   :  { %1129 = vmatpush.msra.mxu1 %v313_v56  ;;  %1148 = vmatpush.msra.mxu2 %v381_v57  ;;  %v684_v56 = vld [vmem:[#allocation8 + $0xd28] sm:$0xff]  ;;  %v569_v58 = vld [vmem:[#allocation8 + $0x990] sm:$0xff] }
  0xd4   :  { %1020 = vmatpush.msra.mxu3 %v396_v7  ;;  %957 = vmatpush.msra.mxu0 %v727_v8  ;;  %v492_v57 = vld [vmem:[#allocation8 + $0x728] sm:$0xff]  ;;  %v641_v59 = vld [vmem:[#allocation8 + $0xbd0] sm:$0xff] }
  0xd5   :  { %1130 = vmatpush.msra.mxu1 %v309_v20  ;;  %1149 = vmatpush.msra.mxu2 %v377_v60  ;;  %v680_v20 = vld [vmem:[#allocation8 + $0xd08] sm:$0xff]  ;;  %v565_v61 = vld [vmem:[#allocation8 + $0x970] sm:$0xff] }
  0xd6   :  { %1021 = vmatpush.msra.mxu3 %v392_v11  ;;  %958 = vmatpush.msra.mxu0 %v723_v12  ;;  %v488_v60 = vld [vmem:[#allocation8 + $0x708] sm:$0xff]  ;;  %v561_v1 = vld [vmem:[#allocation8 + $0x950] sm:$0xff] }
  0xd7   :  { %1131 = vmatpush.msra.mxu1 %v305_v62  ;;  %1150 = vmatpush.msra.mxu2 %v373_v63  ;;  %v637_v62 = vld [vmem:[#allocation8 + $0xbb0] sm:$0xff]  ;;  %v676_v63 = vld [vmem:[#allocation8 + $0xce8] sm:$0xff] }
  0xd8   :  { %1086 = vmatpush.msrb.mxu3 %v708_v15  ;;  %959 = vmatpush.msra.mxu0 %v719_v16  ;;  %v484_v0 = vld [vmem:[#allocation8 + $0x6e8] sm:$0xff] }
  0xd9   :  { %1132 = vmatpush.msra.mxu1 %v301_v2  ;;  %1151 = vmatpush.msra.mxu2 %v369_v3  ;;  %v633_v2 = vld [vmem:[#allocation8 + $0xb90] sm:$0xff]  ;;  %v672_v3 = vld [vmem:[#allocation8 + $0xcc8] sm:$0xff] }
  0xda   :  { %1087 = vmatpush.msrb.mxu3 %v704_v19  ;;  %960 = vmatpush.msra.mxu0 %v715_v21  ;;  %v480_v4 = vld [vmem:[#allocation8 + $0x6c8] sm:$0xff] }
  0xdb   :  { %1133 = vmatpush.msra.mxu1 %v297_v5  ;;  %1152 = vmatpush.msra.mxu2 %v365_v6  ;;  %v557_v5 = vld [vmem:[#allocation8 + $0x930] sm:$0xff]  ;;  %v668_v7 = vld [vmem:[#allocation8 + $0xca8] sm:$0xff] }
  0xdc   :  { %1088 = vmatpush.msrb.mxu3 %v700_v24  ;;  %961 = vmatpush.msra.mxu0 %v711_v25  ;;  %v629_v6 = vld [vmem:[#allocation8 + $0xb70] sm:$0xff]  ;;  %v476_v8 = vld [vmem:[#allocation8 + $0x6a8] sm:$0xff] }
  0xdd   :  { %1134 = vmatpush.msra.mxu1 %v293_v9  ;;  %1153 = vmatpush.msra.mxu2 %v361_v10  ;;  %v553_v9 = vld [vmem:[#allocation8 + $0x910] sm:$0xff]  ;;  %v664_v11 = vld [vmem:[#allocation8 + $0xc88] sm:$0xff] }
  0xde   :  { %1026 = vmatpush.msrb.mxu0 %v516_v29  ;;  %1082 = vmatmul.f32.vlgmr.msrb.gmra.mxu2 %v2725_v48  ;;  %v625_v10 = vld [vmem:[#allocation8 + $0xb50] sm:$0xff]  ;;  %v472_v12 = vld [vmem:[#allocation8 + $0x688] sm:$0xff] }
  0xdf   :  { %1135 = vmatpush.msra.mxu1 %v289_v13  ;;  %1154 = vmatpush.msra.mxu2 %v357_v14  ;;  %v549_v13 = vld [vmem:[#allocation8 + $0x8f0] sm:$0xff]  ;;  %v660_v15 = vld [vmem:[#allocation8 + $0xc68] sm:$0xff] }
  0xe0   :  { %962 = vmatmul.f32.vlgmr.msra.gmra.mxu0 %v2742_v45  ;;  %1089 = vmatpush.msrb.mxu3 %v696_v41  ;;  %v621_v14 = vld [vmem:[#allocation8 + $0xb30] sm:$0xff]  ;;  %v468_v16 = vld [vmem:[#allocation8 + $0x668] sm:$0xff] }
  0xe1   :  { %1136 = vmatpush.msra.mxu1 %v285_v17  ;;  %1155 = vmatpush.msra.mxu2 %v353_v18  ;;  %v545_v17 = vld [vmem:[#allocation8 + $0x8d0] sm:$0xff]  ;;  %v656_v19 = vld [vmem:[#allocation8 + $0xc48] sm:$0xff] }
  0xe2   :  { %1027 = vmatpush.msrb.mxu0 %v512_v32  ;;  %1090 = vmatpush.msrb.mxu3 %v692_v46  ;;  %v617_v18 = vld [vmem:[#allocation8 + $0xb10] sm:$0xff]  ;;  %v464_v21 = vld [vmem:[#allocation8 + $0x648] sm:$0xff] }
  0xe3   :  { %1137 = vmatpush.msra.mxu1 %v281_v22  ;;  %1156 = vmatpush.msra.mxu2 %v349_v23  ;;  %v541_v22 = vld [vmem:[#allocation8 + $0x8b0] sm:$0xff]  ;;  %v460_v24 = vld [vmem:[#allocation8 + $0x628] sm:$0xff] }
  0xe4   :  { %1028 = vmatpush.msrb.mxu0 %v508_v35  ;;  %1091 = vmatpush.msrb.mxu3 %v688_v52  ;;  %v613_v23 = vld [vmem:[#allocation8 + $0xaf0] sm:$0xff]  ;;  %v652_v29 = vld [vmem:[#allocation8 + $0xc28] sm:$0xff] }
  0xe5   :  { %1138 = vmatpush.msra.mxu1 %v277_v26  ;;  %1157 = vmatpush.msra.mxu2 %v345_v30  ;;  %v537_v25 = vld [vmem:[#allocation8 + $0x890] sm:$0xff]  ;;  %v456_v30 = vld [vmem:[#allocation8 + $0x608] sm:$0xff] }
  0xe6   :  { %1029 = vmatpush.msrb.mxu0 %v504_v28  ;;  %1092 = vmatpush.msrb.mxu3 %v684_v56  ;;  %v609_v26 = vld [vmem:[#allocation8 + $0xad0] sm:$0xff]  ;;  %v772_v32 = vld [vmem:[#allocation8 + $0xfe8] sm:$0xff] }
  0xe7   :  { %1139 = vmatpush.msra.mxu1 %v273_v31  ;;  %1158 = vmatpush.msra.mxu2 %v341_v33  ;;  %v533_v31 = vld [vmem:[#allocation8 + $0x870] sm:$0xff]  ;;  %v648_v35 = vld [vmem:[#allocation8 + $0xc08] sm:$0xff] }
  0xe8   :  { %1030 = vmatpush.msrb.mxu0 %v500_v47  ;;  %1093 = vmatpush.msrb.mxu3 %v680_v20  ;;  %v605_v33 = vld [vmem:[#allocation8 + $0xab0] sm:$0xff]  ;;  %v764_v28 = vld [vmem:[#allocation8 + $0xfa8] sm:$0xff] }
  0xe9   :  { %1140 = vmatpush.msra.mxu1 %v269_v34  ;;  %1159 = vmatpush.msra.mxu2 %v337_v39  ;;  %v529_v34 = vld [vmem:[#allocation8 + $0x850] sm:$0xff]  ;;  %v768_v39 = vld [vmem:[#allocation8 + $0xfc8] sm:$0xff] }
  0xea   :  { %1031 = vmatpush.msrb.mxu0 %v496_v53  ;;  %1094 = vmatpush.msrb.mxu3 %v676_v63  ;;  %v525_v41 = vld [vmem:[#allocation8 + $0x830] sm:$0xff]  ;;  %v760_v46 = vld [vmem:[#allocation8 + $0xf88] sm:$0xff] }
  0xeb   :  { %1141 = vmatpush.msra.mxu1 %v265_v40  ;;  %1160 = vmatpush.msra.mxu2 %v333_v44  ;;  %v601_v40 = vld [vmem:[#allocation8 + $0xa90] sm:$0xff]  ;;  %v756_v52 = vld [vmem:[#allocation8 + $0xf68] sm:$0xff] }
  0xec   :  { %1032 = vmatpush.msrb.mxu0 %v492_v57  ;;  %1095 = vmatpush.msrb.mxu3 %v672_v3  ;;  %v521_v44 = vld [vmem:[#allocation8 + $0x810] sm:$0xff]  ;;  %v752_v56 = vld [vmem:[#allocation8 + $0xf48] sm:$0xff] }
  0xed   :  { %1206 = vmatpush.msrb.mxu1 %v581_v43  ;;  %1161 = vmatpush.msra.mxu2 %v329_v50  ;;  %v597_v43 = vld [vmem:[#allocation8 + $0xa70] sm:$0xff]  ;;  %v748_v20 = vld [vmem:[#allocation8 + $0xf28] sm:$0xff] }
  0xee   :  { %1033 = vmatpush.msrb.mxu0 %v488_v60  ;;  %1096 = vmatpush.msrb.mxu3 %v668_v7  ;;  %v593_v47 = vld [vmem:[#allocation8 + $0xa50] sm:$0xff]  ;;  %v744_v63 = vld [vmem:[#allocation8 + $0xf08] sm:$0xff] }
  0xef   :  { %1207 = vmatpush.msrb.mxu1 %v577_v49  ;;  %1226 = vmatpush.msrb.mxu2 %v645_v55  ;;  %v326_v49 = vld [vmem:[#allocation8 + $0x1f8] sm:$0xff]  ;;  %v453_v50 = vld [vmem:[#allocation8 + $0x5f0] sm:$0xff]  ;;  %v740_v3 = vld [vmem:[#allocation8 + $0xee8] sm:$0xff] }
  0xf0   :  { %1034 = vmatpush.msrb.mxu0 %v484_v0  ;;  %1097 = vmatpush.msrb.mxu3 %v664_v11  ;;  %v589_v53 = vld [vmem:[#allocation8 + $0xa30] sm:$0xff]  ;;  %v736_v7 = vld [vmem:[#allocation8 + $0xec8] sm:$0xff] }
  0xf1   :  { %1208 = vmatpush.msrb.mxu1 %v573_v54  ;;  %1227 = vmatpush.msrb.mxu2 %v641_v59  ;;  %v322_v54 = vld [vmem:[#allocation8 + $0x1d8] sm:$0xff]  ;;  %v449_v55 = vld [vmem:[#allocation8 + $0x5d0] sm:$0xff]  ;;  %v732_v11 = vld [vmem:[#allocation8 + $0xea8] sm:$0xff] }
  0xf2   :  { %1035 = vmatpush.msrb.mxu0 %v480_v4  ;;  %1098 = vmatpush.msrb.mxu3 %v660_v15  ;;  %v585_v57 = vld [vmem:[#allocation8 + $0xa10] sm:$0xff]  ;;  %v390_v59 = vld [vmem:[#allocation8 + $0x3f8] sm:$0xff] }
  0xf3   :  { %1209 = vmatpush.msrb.mxu1 %v569_v58  ;;  %1228 = vmatpush.msrb.mxu2 %v637_v62  ;;  %v318_v58 = vld [vmem:[#allocation8 + $0x1b8] sm:$0xff]  ;;  %v445_v60 = vld [vmem:[#allocation8 + $0x5b0] sm:$0xff] }
  0xf4   :  { %1036 = vmatpush.msrb.mxu0 %v476_v8  ;;  %1099 = vmatpush.msrb.mxu3 %v656_v19  ;;  %v386_v62 = vld [vmem:[#allocation8 + $0x3d8] sm:$0xff]  ;;  %v441_v0 = vld [vmem:[#allocation8 + $0x590] sm:$0xff] }
  0xf5   :  { %1210 = vmatpush.msrb.mxu1 %v565_v61  ;;  %1229 = vmatpush.msrb.mxu2 %v633_v2  ;;  %v314_v61 = vld [vmem:[#allocation8 + $0x198] sm:$0xff]  ;;  %v437_v4 = vld [vmem:[#allocation8 + $0x570] sm:$0xff] }
  0xf6   :  { %1037 = vmatpush.msrb.mxu0 %v472_v12  ;;  %1142 = vmatmul.f32.vlgmr.msra.gmra.mxu1 %v2689_v38  ;;  %v382_v2 = vld [vmem:[#allocation8 + $0x3b8] sm:$0xff]  ;;  %v433_v8 = vld [vmem:[#allocation8 + $0x550] sm:$0xff] }
  0xf7   :  { %1211 = vmatpush.msrb.mxu1 %v561_v1  ;;  %1230 = vmatpush.msrb.mxu2 %v629_v6  ;;  %v310_v1 = vld [vmem:[#allocation8 + $0x178] sm:$0xff]  ;;  %v429_v15 = vld [vmem:[#allocation8 + $0x530] sm:$0xff] }
  0xf8   :  { %1038 = vmatpush.msrb.mxu0 %v468_v16  ;;  %1100 = vmatpush.msrb.mxu3 %v652_v29  ;;  %v378_v6 = vld [vmem:[#allocation8 + $0x398] sm:$0xff]  ;;  %v425_v19 = vld [vmem:[#allocation8 + $0x510] sm:$0xff]  ;;  %v716_v29 = vld [vmem:[#allocation8 + $0xe28] sm:$0xff] }
  0xf9   :  { %1212 = vmatpush.msrb.mxu1 %v557_v5  ;;  %1231 = vmatpush.msrb.mxu2 %v625_v10  ;;  %v306_v5 = vld [vmem:[#allocation8 + $0x158] sm:$0xff] }
  0xfa   :  { %1039 = vmatpush.msrb.mxu0 %v464_v21  ;;  %1101 = vmatpush.msrb.mxu3 %v648_v35  ;;  %v374_v10 = vld [vmem:[#allocation8 + $0x378] sm:$0xff]  ;;  %v517_v35 = vld [vmem:[#allocation8 + $0x7f0] sm:$0xff] }
  0xfb   :  { %1213 = vmatpush.msrb.mxu1 %v553_v9  ;;  %1232 = vmatpush.msrb.mxu2 %v621_v14  ;;  %v302_v9 = vld [vmem:[#allocation8 + $0x138] sm:$0xff]  ;;  %v728_v14 = vld [vmem:[#allocation8 + $0xe88] sm:$0xff] }
  0xfc   :  { %1040 = vmatpush.msrb.mxu0 %v460_v24  ;;  %1022 = vmatmul.f32.vlgmr.msra.gmra.mxu3 %v2730_v51  ;;  %v298_v12 = vld [vmem:[#allocation8 + $0x118] sm:$0xff]  ;;  %v421_v24 = vld [vmem:[#allocation8 + $0x4f0] sm:$0xff] }
  0xfd   :  { %1214 = vmatpush.msrb.mxu1 %v549_v13  ;;  %1233 = vmatpush.msrb.mxu2 %v617_v18  ;;  %v370_v13 = vld [vmem:[#allocation8 + $0x358] sm:$0xff]  ;;  %v724_v18 = vld [vmem:[#allocation8 + $0xe68] sm:$0xff] }
  0xfe   :  { %1041 = vmatpush.msrb.mxu0 %v456_v30  ;;  %1162 = vmatmul.f32.vlgmr.msra.gmra.mxu2 %v2692_v42  ;;  %v294_v16 = vld [vmem:[#allocation8 + $0xf8] sm:$0xff]  ;;  %v417_v30 = vld [vmem:[#allocation8 + $0x4d0] sm:$0xff] }
  0xff   :  { %1215 = vmatpush.msrb.mxu1 %v545_v17  ;;  %1234 = vmatpush.msrb.mxu2 %v613_v23  ;;  %v366_v17 = vld [vmem:[#allocation8 + $0x338] sm:$0xff]  ;;  %v720_v23 = vld [vmem:[#allocation8 + $0xe48] sm:$0xff] }
 0x100   :  { %1106 = vmatpush.msra.mxu0 %v772_v32  ;;  %1166 = vmatpush.msra.mxu3 %v453_v50  ;;  %v290_v21 = vld [vmem:[#allocation8 + $0xd8] sm:$0xff] }
 0x101   :  { %1216 = vmatpush.msrb.mxu1 %v541_v22  ;;  %1235 = vmatpush.msrb.mxu2 %v609_v26  ;;  %v362_v22 = vld [vmem:[#allocation8 + $0x318] sm:$0xff] }
 0x102   :  { %1107 = vmatpush.msra.mxu0 %v768_v39  ;;  %1167 = vmatpush.msra.mxu3 %v449_v55  ;;  %v358_v26 = vld [vmem:[#allocation8 + $0x2f8] sm:$0xff] }
 0x103   :  { %1217 = vmatpush.msrb.mxu1 %v537_v25  ;;  %1236 = vmatpush.msrb.mxu2 %v605_v33  ;;  %v286_v25 = vld [vmem:[#allocation8 + $0xb8] sm:$0xff]  ;;  %v712_v33 = vld [vmem:[#allocation8 + $0xe08] sm:$0xff] }
 0x104   :  { %1108 = vmatpush.msra.mxu0 %v764_v28  ;;  %1168 = vmatpush.msra.mxu3 %v445_v60  ;;  %v354_v32 = vld [vmem:[#allocation8 + $0x2d8] sm:$0xff]  ;;  %v513_v28 = vld [vmem:[#allocation8 + $0x7d0] sm:$0xff] }
 0x105   :  { %1218 = vmatpush.msrb.mxu1 %v533_v31  ;;  %1237 = vmatpush.msrb.mxu2 %v601_v40  ;;  %v282_v31 = vld [vmem:[#allocation8 + $0x98] sm:$0xff]  ;;  %v393_v60 = vld [vmem:[#allocation8 + $0x410] sm:$0xff] }
 0x106   :  { %1109 = vmatpush.msra.mxu0 %v760_v46  ;;  %1169 = vmatpush.msra.mxu3 %v441_v0  ;;  %v278_v39 = vld [vmem:[#allocation8 + $0x78] sm:$0xff]  ;;  %v405_v46 = vld [vmem:[#allocation8 + $0x470] sm:$0xff] }
 0x107   :  { %1219 = vmatpush.msrb.mxu1 %v529_v34  ;;  %1238 = vmatpush.msrb.mxu2 %v597_v43  ;;  %v413_v34 = vld [vmem:[#allocation8 + $0x4b0] sm:$0xff]  ;;  %v350_v40 = vld [vmem:[#allocation8 + $0x2b8] sm:$0xff] }
 0x108   :  { %1110 = vmatpush.msra.mxu0 %v756_v52  ;;  %1170 = vmatpush.msra.mxu3 %v437_v4  ;;  %v274_v43 = vld [vmem:[#allocation8 + $0x58] sm:$0xff]  ;;  %v401_v52 = vld [vmem:[#allocation8 + $0x450] sm:$0xff] }
 0x109   :  { %1220 = vmatpush.msrb.mxu1 %v525_v41  ;;  %1239 = vmatpush.msrb.mxu2 %v593_v47  ;;  %v409_v41 = vld [vmem:[#allocation8 + $0x490] sm:$0xff]  ;;  %v342_v50 = vld [vmem:[#allocation8 + $0x278] sm:$0xff] }
 0x10a   :  { %1111 = vmatpush.msra.mxu0 %v752_v56  ;;  %1171 = vmatpush.msra.mxu3 %v433_v8  ;;  %v509_v47 = vld [vmem:[#allocation8 + $0x7b0] sm:$0xff]  ;;  %v338_v55 = vld [vmem:[#allocation8 + $0x258] sm:$0xff] }
 0x10b   :  { %1221 = vmatpush.msrb.mxu1 %v521_v44  ;;  %1240 = vmatpush.msrb.mxu2 %v589_v53  ;;  %v346_v44 = vld [vmem:[#allocation8 + $0x298] sm:$0xff]  ;;  %v505_v53 = vld [vmem:[#allocation8 + $0x790] sm:$0xff] }
 0x10c   :  { %1112 = vmatpush.msra.mxu0 %v748_v20  ;;  %1102 = vmatmul.f32.vlgmr.msrb.gmra.mxu3 %v2739_v36  ;;  %v582_v56 = vld [vmem:[#allocation8 + $0x9f8] sm:$0xff] }
 0x10d   :  { %1286 = vmatpush.msra.mxu1 %v326_v49  ;;  %1241 = vmatpush.msrb.mxu2 %v585_v57  ;;  %v270_v49 = vld [vmem:[#allocation8 + $0x38] sm:$0xff]  ;;  %v397_v57 = vld [vmem:[#allocation8 + $0x430] sm:$0xff] }
 0x10e   :  { %1113 = vmatpush.msra.mxu0 %v744_v63  ;;  %1172 = vmatpush.msra.mxu3 %v429_v15  ;;  %v578_v20 = vld [vmem:[#allocation8 + $0x9d8] sm:$0xff]  ;;  %v709_v63 = vld [vmem:[#allocation8 + $0xdf0] sm:$0xff] }
 0x10f   :  { %1287 = vmatpush.msra.mxu1 %v322_v54  ;;  %1306 = vmatpush.msra.mxu2 %v390_v59  ;;  %v266_v54 = vld [vmem:[#allocation8 + $0x18] sm:$0xff]  ;;  %v693_v15 = vld [vmem:[#allocation8 + $0xd70] sm:$0xff] }
 0x110   :  { %1114 = vmatpush.msra.mxu0 %v740_v3  ;;  %1173 = vmatpush.msra.mxu3 %v425_v19  ;;  %v334_v59 = vld [vmem:[#allocation8 + $0x238] sm:$0xff]  ;;  %v705_v3 = vld [vmem:[#allocation8 + $0xdd0] sm:$0xff] }
 0x111   :  { %1288 = vmatpush.msra.mxu1 %v318_v58  ;;  %1307 = vmatpush.msra.mxu2 %v386_v62  ;;  %v501_v58 = vld [vmem:[#allocation8 + $0x770] sm:$0xff]  ;;  %v330_v62 = vld [vmem:[#allocation8 + $0x218] sm:$0xff] }
 0x112   :  { %1115 = vmatpush.msra.mxu0 %v736_v7  ;;  %1174 = vmatpush.msra.mxu3 %v421_v24  ;;  %v574_v0 = vld [vmem:[#allocation8 + $0x9b8] sm:$0xff]  ;;  %v701_v7 = vld [vmem:[#allocation8 + $0xdb0] sm:$0xff] }
 0x113   :  { %1289 = vmatpush.msra.mxu1 %v314_v61  ;;  %1308 = vmatpush.msra.mxu2 %v382_v2  ;;  %v497_v61 = vld [vmem:[#allocation8 + $0x750] sm:$0xff]  ;;  %v570_v4 = vld [vmem:[#allocation8 + $0x998] sm:$0xff] }
 0x114   :  { %1116 = vmatpush.msra.mxu0 %v732_v11  ;;  %1175 = vmatpush.msra.mxu3 %v417_v30  ;;  %v493_v2 = vld [vmem:[#allocation8 + $0x730] sm:$0xff]  ;;  %v566_v8 = vld [vmem:[#allocation8 + $0x978] sm:$0xff] }
 0x115   :  { %1290 = vmatpush.msra.mxu1 %v310_v1  ;;  %1309 = vmatpush.msra.mxu2 %v378_v6  ;;  %v646_v1 = vld [vmem:[#allocation8 + $0xbf8] sm:$0xff]  ;;  %v489_v6 = vld [vmem:[#allocation8 + $0x710] sm:$0xff] }
 0x116   :  { %1117 = vmatpush.msra.mxu0 %v728_v14  ;;  %1176 = vmatpush.msra.mxu3 %v413_v34  ;;  %v697_v11 = vld [vmem:[#allocation8 + $0xd90] sm:$0xff] }
 0x117   :  { %1291 = vmatpush.msra.mxu1 %v306_v5  ;;  %1310 = vmatpush.msra.mxu2 %v374_v10  ;;  %v642_v5 = vld [vmem:[#allocation8 + $0xbd8] sm:$0xff]  ;;  %v485_v10 = vld [vmem:[#allocation8 + $0x6f0] sm:$0xff] }
 0x118   :  { %1042 = vmatmul.f32.vlgmr.msrb.gmra.mxu0 %v2735_v27  ;;  %1177 = vmatpush.msra.mxu3 %v409_v41  ;;  %v481_v14 = vld [vmem:[#allocation8 + $0x6d0] sm:$0xff] }
 0x119   :  { %1292 = vmatpush.msra.mxu1 %v302_v9  ;;  %1311 = vmatpush.msra.mxu2 %v370_v13  ;;  %v638_v9 = vld [vmem:[#allocation8 + $0xbb8] sm:$0xff]  ;;  %v689_v19 = vld [vmem:[#allocation8 + $0xd50] sm:$0xff] }
 0x11a   :  { %1118 = vmatpush.msra.mxu0 %v724_v18  ;;  %1178 = vmatpush.msra.mxu3 %v405_v46  ;;  %v634_v13 = vld [vmem:[#allocation8 + $0xb98] sm:$0xff]  ;;  %v477_v18 = vld [vmem:[#allocation8 + $0x6b0] sm:$0xff] }
 0x11b   :  { %1293 = vmatpush.msra.mxu1 %v298_v12  ;;  %1312 = vmatpush.msra.mxu2 %v366_v17  ;;  %v562_v12 = vld [vmem:[#allocation8 + $0x958] sm:$0xff]  ;;  %v685_v24 = vld [vmem:[#allocation8 + $0xd30] sm:$0xff] }
 0x11c   :  { %1119 = vmatpush.msra.mxu0 %v720_v23  ;;  %1179 = vmatpush.msra.mxu3 %v401_v52  ;;  %v630_v17 = vld [vmem:[#allocation8 + $0xb78] sm:$0xff]  ;;  %v473_v23 = vld [vmem:[#allocation8 + $0x690] sm:$0xff] }
 0x11d   :  { %1294 = vmatpush.msra.mxu1 %v294_v16  ;;  %1313 = vmatpush.msra.mxu2 %v362_v22  ;;  %v558_v16 = vld [vmem:[#allocation8 + $0x938] sm:$0xff]  ;;  %v681_v30 = vld [vmem:[#allocation8 + $0xd10] sm:$0xff] }
 0x11e   :  { %1120 = vmatpush.msra.mxu0 %v716_v29  ;;  %1222 = vmatmul.f32.vlgmr.msrb.gmra.mxu1 %v2722_v37  ;;  %v626_v22 = vld [vmem:[#allocation8 + $0xb58] sm:$0xff]  ;;  %v469_v29 = vld [vmem:[#allocation8 + $0x670] sm:$0xff] }
 0x11f   :  { %1295 = vmatpush.msra.mxu1 %v290_v21  ;;  %1314 = vmatpush.msra.mxu2 %v358_v26  ;;  %v554_v21 = vld [vmem:[#allocation8 + $0x918] sm:$0xff]  ;;  %v677_v34 = vld [vmem:[#allocation8 + $0xcf0] sm:$0xff] }
 0x120   :  { %1121 = vmatpush.msra.mxu0 %v712_v33  ;;  %1180 = vmatpush.msra.mxu3 %v397_v57  ;;  %v622_v26 = vld [vmem:[#allocation8 + $0xb38] sm:$0xff]  ;;  %v465_v33 = vld [vmem:[#allocation8 + $0x650] sm:$0xff] }
 0x121   :  { %1296 = vmatpush.msra.mxu1 %v286_v25  ;;  %1315 = vmatpush.msra.mxu2 %v354_v32  ;;  %v550_v25 = vld [vmem:[#allocation8 + $0x8f8] sm:$0xff]  ;;  %v673_v41 = vld [vmem:[#allocation8 + $0xcd0] sm:$0xff] }
 0x122   :  { %1122 = vmatmul.f32.vlgmr.msra.gmra.mxu0 %v2742_v45  ;;  %1181 = vmatpush.msra.mxu3 %v393_v60  ;;  %v618_v32 = vld [vmem:[#allocation8 + $0xb18] sm:$0xff]  ;;  %v769_v57 = vld [vmem:[#allocation8 + $0xfd0] sm:$0xff] }
 0x123   :  { %1297 = vmatpush.msra.mxu1 %v282_v31  ;;  %1186 = vmatpush.msrb.mxu0 %v517_v35  ;;  %v546_v31 = vld [vmem:[#allocation8 + $0x8d8] sm:$0xff]  ;;  %v765_v60 = vld [vmem:[#allocation8 + $0xfb0] sm:$0xff] }
 0x124   :  { %1316 = vmatpush.msra.mxu2 %v350_v40  ;;  %1246 = vmatpush.msrb.mxu3 %v709_v63  ;;  %v542_v35 = vld [vmem:[#allocation8 + $0x8b8] sm:$0xff]  ;;  %v461_v40 = vld [vmem:[#allocation8 + $0x630] sm:$0xff] }
 0x125   :  { %1298 = vmatpush.msra.mxu1 %v278_v39  ;;  %1187 = vmatpush.msrb.mxu0 %v513_v28  ;;  %v614_v39 = vld [vmem:[#allocation8 + $0xaf8] sm:$0xff]  ;;  %v657_v63 = vld [vmem:[#allocation8 + $0xc50] sm:$0xff] }
 0x126   :  { %1317 = vmatpush.msra.mxu2 %v346_v44  ;;  %1247 = vmatpush.msrb.mxu3 %v705_v3  ;;  %v2183_v28 = vld [vmem:[#allocation7] ss:$0 sm:$0xff] }
 0x127   :  { %1299 = vmatpush.msra.mxu1 %v274_v43  ;;  %1188 = vmatpush.msrb.mxu0 %v509_v47  ;;  %v2758_v43 = vpop.permute.xlu1 %1795  ;;  %v538_v44 = vld [vmem:[#allocation8 + $0x898] sm:$0xff]  ;;  %v457_v47 = vld [vmem:[#allocation8 + $0x610] sm:$0xff] }
 0x128   :  { %1318 = vmatpush.msra.mxu2 %v342_v50  ;;  %1248 = vmatpush.msrb.mxu3 %v701_v7  ;;  %v610_v46 = vld [vmem:[#allocation8 + $0xad8] sm:$0xff]  ;;  %v773_v50 = vld [vmem:[#allocation8 + $0xff0] sm:$0xff] }
 0x129   :  { %1300 = vmatpush.msra.mxu1 %v270_v49  ;;  %1189 = vmatpush.msrb.mxu0 %v505_v53  ;;  %v669_v49 = vld [vmem:[#allocation8 + $0xcb0] sm:$0xff]  ;;  %v534_v52 = vld [vmem:[#allocation8 + $0x878] sm:$0xff] }
 0x12a   :  { %1319 = vmatpush.msra.mxu2 %v338_v55  ;;  %1249 = vmatpush.msrb.mxu3 %v697_v11  ;;  %v1479_v11 = vld [vmem:[%s3477_s7 + $0x70] sm:$0xff] }
 0x12b   :  { %1301 = vmatpush.msra.mxu1 %v266_v54  ;;  %1190 = vmatpush.msrb.mxu0 %v501_v58  ;;  %v606_v54 = vld [vmem:[#allocation8 + $0xab8] sm:$0xff] }
 0x12c   :  { %1320 = vmatpush.msra.mxu2 %v334_v59  ;;  %1250 = vmatpush.msrb.mxu3 %v693_v15  ;;  %v530_v58 = vld [vmem:[#allocation8 + $0x858] sm:$0xff] }
 0x12d   :  { %1366 = vmatpush.msrb.mxu1 %v582_v56  ;;  %1191 = vmatpush.msrb.mxu0 %v497_v61  ;;  %v665_v56 = vld [vmem:[#allocation8 + $0xc90] sm:$0xff]  ;;  %v602_v59 = vld [vmem:[#allocation8 + $0xa98] sm:$0xff] }
 0x12e   :  { %1321 = vmatpush.msra.mxu2 %v330_v62  ;;  %1251 = vmatpush.msrb.mxu3 %v689_v19  ;;  %v526_v61 = vld [vmem:[#allocation8 + $0x838] sm:$0xff] }
 0x12f   :  { %1367 = vmatpush.msrb.mxu1 %v578_v20  ;;  %1242 = vmatmul.f32.vlgmr.msrb.gmra.mxu2 %v2725_v48  ;;  %v661_v20 = vld [vmem:[#allocation8 + $0xc70] sm:$0xff]  ;;  %v598_v62 = vld [vmem:[#allocation8 + $0xa78] sm:$0xff]  ;;  %v1789_v3 = vpop.permute.xlu1 %1788 }
 0x130   :  { %1386 = vmatpush.msrb.mxu2 %v646_v1  ;;  %1192 = vmatpush.msrb.mxu0 %v493_v2  ;;  %v522_v1 = vld [vmem:[#allocation8 + $0x818] sm:$0xff] }
 0x131   :  { %1368 = vmatpush.msrb.mxu1 %v574_v0  ;;  %1252 = vmatpush.msrb.mxu3 %v685_v24  ;;  %v250_v53 = vpop.f32.mrf.mxu0  ;;  %v761_v0 = vld [vmem:[#allocation8 + $0xf90] sm:$0xff]  ;;  %v594_v2 = vld [vmem:[#allocation8 + $0xa58] sm:$0xff]  ;;  %v1477_v24 = vld [vmem:[%s3477_s7 + $0x60] sm:$0xff] }
 0x132   :  { %1387 = vmatpush.msrb.mxu2 %v642_v5  ;;  %1193 = vmatpush.msrb.mxu0 %v489_v6  ;;  %v251_v55 = vadd.f32 %v2183_v28, %v250_v53  ;;  %v653_v5 = vld [vmem:[#allocation8 + $0xc30] sm:$0xff]  ;;  %v586_v15 = vld [vmem:[#allocation8 + $0xa18] sm:$0xff] }
 0x133   :  { %1369 = vmatpush.msrb.mxu1 %v570_v4  ;;  %1253 = vmatpush.msrb.mxu3 %v681_v30  ;;  %v1480_v4 = vld [vmem:[%s3477_s7 + $0x78] sm:$0xff] }
 0x134   :  { %1388 = vmatpush.msrb.mxu2 %v638_v9  ;;  %1194 = vmatpush.msrb.mxu0 %v485_v10  ;;  %2188 = vtanh.f32 %v251_v55  ;;  %v590_v9 = vld [vmem:[#allocation8 + $0xa38] sm:$0xff] }
 0x135   :  { %1370 = vmatpush.msrb.mxu1 %v566_v8  ;;  %1254 = vmatpush.msrb.mxu3 %v677_v34  ;;  %v757_v8 = vld [vmem:[#allocation8 + $0xf70] sm:$0xff]  ;;  %v1496_v19 = vld [vmem:[%s3477_s7 + $0xf8] sm:$0xff] }
 0x136   :  { %1389 = vmatpush.msrb.mxu2 %v634_v13  ;;  %1195 = vmatpush.msrb.mxu0 %v481_v14  ;;  %v649_v13 = vld [vmem:[#allocation8 + $0xc10] sm:$0xff]  ;;  %v434_v55 = vld [vmem:[#allocation8 + $0x558] sm:$0xff] }
 0x137   :  { %1371 = vmatpush.msrb.mxu1 %v562_v12  ;;  %1255 = vmatpush.msrb.mxu3 %v673_v41  ;;  %v753_v14 = vld [vmem:[#allocation8 + $0xf50] sm:$0xff] }
 0x138   :  { %1390 = vmatpush.msrb.mxu2 %v630_v17  ;;  %1196 = vmatpush.msrb.mxu0 %v477_v18  ;;  %v1478_v18 = vld [vmem:[%s3477_s7 + $0x68] sm:$0xff]  ;;  %v1475_v41 = vld [vmem:[%s3477_s7 + $0x50] sm:$0xff] }
 0x139   :  { %1372 = vmatpush.msrb.mxu1 %v558_v16  ;;  %1256 = vmatpush.msrb.mxu3 %v669_v49  ;;  %v1474_v49 = vld [vmem:[%s3477_s7 + $0x48] sm:$0xff] }
 0x13a   :  { %1391 = vmatpush.msrb.mxu2 %v626_v22  ;;  %1197 = vmatpush.msrb.mxu0 %v473_v23  ;;  %v2189_v7 = vpop.eup %2188  ;;  %v450_v23 = vld [vmem:[#allocation8 + $0x5d8] sm:$0xff] }
 0x13b   :  { %1373 = vmatpush.msrb.mxu1 %v554_v21  ;;  %1257 = vmatpush.msrb.mxu3 %v665_v56  ;;  %259 = vst.msk [vmem:[#allocation19] sm:$0xff] %vm258_vm4, %v2189_v7  ;;  %v1797_v12 = vmul.f32 %v2189_v7, %v1789_v3  ;;  %v749_v21 = vld [vmem:[#allocation8 + $0xf30] sm:$0xff]  ;;  %v1473_v56 = vld [vmem:[%s3477_s7 + $0x40] sm:$0xff] }
 0x13c   :  { %1392 = vmatpush.msrb.mxu2 %v622_v26  ;;  %1198 = vmatpush.msrb.mxu0 %v469_v29  ;;  %v1495_v26 = vld [vmem:[%s3477_s7 + $0xf0] sm:$0xff] }
 0x13d   :  { %1374 = vmatpush.msrb.mxu1 %v550_v25  ;;  %1258 = vmatpush.msrb.mxu3 %v661_v20  ;;  %v253_v6 = vpop.f32.mrf.mxu0  ;;  %v1799_v16 = vsel %vm258_vm4, %v1797_v12, 0.0  ;;  %v1781_v25 = vpop.xlane.xlu2 %1780  ;;  %v745_v29 = vld [vmem:[#allocation8 + $0xf10] sm:$0xff]  ;;  %v430_v20 = vld [vmem:[#allocation8 + $0x538] sm:$0xff] }
 0x13e   :  { %1393 = vmatpush.msrb.mxu2 %v618_v32  ;;  %1199 = vmatpush.msrb.mxu0 %v465_v33  ;;  %v254_v10 = vadd.f32 %v2183_v28, %v253_v6  ;;  %v1800_v17 = vrot.slane %v1799_v16, 4  ;;  %v1494_v33 = vld [vmem:[%s3477_s7 + $0xe8] sm:$0xff]  ;;  %v1782_v34 = vmax.f32 %v1781_v25, 1.0  ;;  %v1471_v3 = vld [vmem:[%s3477_s7 + $0x30] sm:$0xff] }
 0x13f   :  { %1375 = vmatpush.msrb.mxu1 %v546_v31  ;;  %1259 = vmatpush.msrb.mxu3 %v657_v63  ;;  %v446_v31 = vld [vmem:[#allocation8 + $0x5b8] sm:$0xff]  ;;  %v725_v63 = vld [vmem:[#allocation8 + $0xe70] sm:$0xff] }
 0x140   :  { %1394 = vmatpush.msrb.mxu2 %v614_v39  ;;  %1200 = vmatpush.msrb.mxu0 %v461_v40  ;;  %2190 = vtanh.f32 %v254_v10  ;;  %v1801_v22 = vadd.f32 %v1800_v17, %v1799_v16  ;;  %v442_v40 = vld [vmem:[#allocation8 + $0x598] sm:$0xff]  ;;  %v721_v6 = vld [vmem:[#allocation8 + $0xe50] sm:$0xff] }
 0x141   :  { %1376 = vmatpush.msrb.mxu1 %v542_v35  ;;  %1260 = vmatpush.msrb.mxu3 %v653_v5  ;;  %v741_v35 = vld [vmem:[#allocation8 + $0xef0] sm:$0xff]  ;;  %2192 = vrcp.f32 %v1782_v34  ;;  %v1489_v5 = vld [vmem:[%s3477_s7 + $0xc0] sm:$0xff]  ;;  %v410_v25 = vld [vmem:[#allocation8 + $0x498] sm:$0xff] }
 0x142   :  { %1395 = vmatpush.msrb.mxu2 %v610_v46  ;;  %1201 = vmatpush.msrb.mxu0 %v457_v47  ;;  %v1802_v39 = vrot.slane %v1801_v22, 2  ;;  %v438_v47 = vld [vmem:[#allocation8 + $0x578] sm:$0xff]  ;;  %v717_v12 = vld [vmem:[#allocation8 + $0xe30] sm:$0xff] }
 0x143   :  { %1377 = vmatpush.msrb.mxu1 %v538_v44  ;;  %1261 = vmatpush.msrb.mxu3 %v649_v13  ;;  %v737_v44 = vld [vmem:[#allocation8 + $0xed0] sm:$0xff]  ;;  %v1484_v34 = vld [vmem:[%s3477_s7 + $0x98] sm:$0xff] }
 0x144   :  { %1266 = vmatpush.msra.mxu0 %v773_v50  ;;  %1396 = vmatpush.msrb.mxu2 %v606_v54  ;;  %v1492_v50 = vld [vmem:[%s3477_s7 + $0xd8] sm:$0xff]  ;;  %v1803_v54 = vadd.f32 %v1802_v39, %v1801_v22  ;;  %v1487_v16 = vld [vmem:[%s3477_s7 + $0xb0] sm:$0xff] }
 0x145   :  { %1378 = vmatpush.msrb.mxu1 %v534_v52  ;;  %1182 = vmatmul.f32.vlgmr.msra.gmra.mxu3 %v2730_v51  ;;  %v733_v52 = vld [vmem:[#allocation8 + $0xeb0] sm:$0xff]  ;;  %v1468_v22 = vld [vmem:[%s3477_s7 + $0x18] sm:$0xff] }
 0x146   :  { %1267 = vmatpush.msra.mxu0 %v769_v57  ;;  %1397 = vmatpush.msrb.mxu2 %v602_v59  ;;  %v2191_v30 = vpop.eup %2190  ;;  %v1491_v57 = vld [vmem:[%s3477_s7 + $0xd0] sm:$0xff] }
 0x147   :  { %1379 = vmatpush.msrb.mxu1 %v530_v58  ;;  %1322 = vmatmul.f32.vlgmr.msra.gmra.mxu2 %v2692_v42  ;;  %v1476_v42 = vld [vmem:[%s3477_s7 + $0x58] sm:$0xff]  ;;  %v1798_v32 = vmul.f32 %v2191_v30, %v2758_v43  ;;  %260 = vst.msk [vmem:[#allocation19 + $0x8] sm:$0xff] %vm258_vm4, %v2191_v30  ;;  %v1493_v43 = vld [vmem:[%s3477_s7 + $0xe0] sm:$0xff]  ;;  %v729_v58 = vld [vmem:[#allocation8 + $0xe90] sm:$0xff] }
 0x148   :  { %1268 = vmatpush.msra.mxu0 %v765_v60  ;;  %1398 = vmatpush.msrb.mxu2 %v598_v62  ;;  %v1472_v60 = vld [vmem:[%s3477_s7 + $0x38] sm:$0xff]  ;;  %v1490_v62 = vld [vmem:[%s3477_s7 + $0xc8] sm:$0xff] }
 0x149   :  { %1380 = vmatpush.msrb.mxu1 %v526_v61  ;;  %v1806_v28 = vsel %vm258_vm4, %v1798_v32, 0.0  ;;  %v1804_v61 = vrot.slane %v1803_v54, 1  ;;  %1202 = vmatmul.f32.vlgmr.msrb.gmra.mxu0 %v2735_v27  ;;  %v713_v17 = vld [vmem:[#allocation8 + $0xe10] sm:$0xff]  ;;  %v510_v32 = vld [vmem:[#allocation8 + $0x7b8] sm:$0xff] }
 0x14a   :  { %1269 = vmatpush.msra.mxu0 %v761_v0  ;;  %1399 = vmatpush.msrb.mxu2 %v594_v2  ;;  %v1807_v46 = vrot.slane %v1806_v28, 4  ;;  %v426_v2 = vld [vmem:[#allocation8 + $0x518] sm:$0xff] }
 0x14b   :  { %1381 = vmatpush.msrb.mxu1 %v522_v1  ;;  %v2193_v1 = vpop.eup %2192  ;;  %v1805_v10 = vadd.f32 %v1804_v61, %v1803_v54  ;;  %v506_v39 = vld [vmem:[#allocation8 + $0x798] sm:$0xff] }
 0x14c   :  { %1302 = vmatmul.f32.vlgmr.msra.gmra.mxu1 %v2689_v38  ;;  %1270 = vmatpush.msra.mxu0 %v757_v8  ;;  %v454_v38 = vld [vmem:[#allocation8 + $0x5f8] sm:$0xff]  ;;  %v1808_v53 = vadd.f32 %v1807_v46, %v1806_v28  ;;  %v1482_v46 = vld [vmem:[%s3477_s7 + $0x88] sm:$0xff] }
 0x14d   :  { %1616 = vmatpush.msra.mxu1 %v1480_v4  ;;  %1400 = vmatpush.msrb.mxu2 %v590_v9  ;;  %v1815_v4 = vrot.slane %v2193_v1, 1  ;;  %v422_v8 = vld [vmem:[#allocation8 + $0x4f8] sm:$0xff]  ;;  %v1470_v9 = vld [vmem:[%s3477_s7 + $0x28] sm:$0xff] }
 0x14e   :  { %1271 = vmatpush.msra.mxu0 %v753_v14  ;;  %1326 = vmatpush.msra.mxu3 %v454_v38  ;;  %v1809_v59 = vrot.slane %v1808_v53, 2  ;;  %v418_v14 = vld [vmem:[#allocation8 + $0x4d8] sm:$0xff] }
 0x14f   :  { %1617 = vmatpush.msra.mxu1 %v1479_v11  ;;  %1401 = vmatpush.msrb.mxu2 %v586_v15  ;;  %v1488_v11 = vld [vmem:[%s3477_s7 + $0xb8] sm:$0xff]  ;;  %v1469_v15 = vld [vmem:[%s3477_s7 + $0x20] sm:$0xff] }
 0x150   :  { %1272 = vmatpush.msra.mxu0 %v749_v21  ;;  %1327 = vmatpush.msra.mxu3 %v450_v23  ;;  %v1810_v0 = vadd.f32 %v1809_v59, %v1808_v53  ;;  %v518_v21 = vld [vmem:[#allocation8 + $0x7f8] sm:$0xff] }
 0x151   :  { %1618 = vmatpush.msra.mxu1 %v1478_v18  ;;  %1636 = vmatpush.msra.mxu2 %v1496_v19  ;;  %v414_v18 = vld [vmem:[#allocation8 + $0x4b8] sm:$0xff]  ;;  %v1818_v19 = vmul.f32 %v2193_v1, %v1805_v10  ;;  %v1557_v1 = vld [vmem:[%s3477_s7 + $0x2e0] sm:$0xff] }
 0x152   :  { %1273 = vmatpush.msra.mxu0 %v745_v29  ;;  %1328 = vmatpush.msra.mxu3 %v446_v31  ;;  %v1811_v7 = vrot.slane %v1810_v0, 1  ;;  %v1467_v29 = vld [vmem:[%s3477_s7 + $0x10] sm:$0xff]  ;;  %v1485_v31 = vld [vmem:[%s3477_s7 + $0xa0] sm:$0xff]  ;;  %v1544_v28 = vld [vmem:[%s3477_s7 + $0x278] sm:$0xff] }
 0x153   :  { %1619 = vmatpush.msra.mxu1 %v1477_v24  ;;  %1637 = vmatpush.msra.mxu2 %v1495_v26  ;;  %v1486_v24 = vld [vmem:[%s3477_s7 + $0xa8] sm:$0xff]  ;;  %v514_v26 = vld [vmem:[#allocation8 + $0x7d8] sm:$0xff] }
 0x154   :  { %1274 = vmatpush.msra.mxu0 %v741_v35  ;;  %1329 = vmatpush.msra.mxu3 %v442_v40  ;;  %v1812_v13 = vadd.f32 %v1811_v7, %v1810_v0  ;;  %v402_v35 = vld [vmem:[#allocation8 + $0x458] sm:$0xff]  ;;  %v1465_v40 = vld [vmem:[%s3477_s7] sm:$0xff] }
 0x155   :  { %1620 = vmatpush.msra.mxu1 %v1476_v42  ;;  %1638 = vmatpush.msra.mxu2 %v1494_v33  ;;  %v406_v42 = vld [vmem:[#allocation8 + $0x478] sm:$0xff]  ;;  %v1466_v33 = vld [vmem:[%s3477_s7 + $0x8] sm:$0xff] }
 0x156   :  { %1275 = vmatpush.msra.mxu0 %v737_v44  ;;  %1330 = vmatpush.msra.mxu3 %v438_v47  ;;  %v1819_v38 = vmul.f32 %v1815_v4, %v1812_v13  ;;  %v502_v44 = vld [vmem:[#allocation8 + $0x778] sm:$0xff]  ;;  %v1538_v4 = vld [vmem:[%s3477_s7 + $0x248] sm:$0xff]  ;;  %v2913_v13 = vld [vmem:[#allocation10] sm:$0xf] }
 0x157   :  { %1621 = vmatpush.msra.mxu1 %v1475_v41  ;;  %1639 = vmatpush.msra.mxu2 %v1493_v43  ;;  %v1483_v41 = vld [vmem:[%s3477_s7 + $0x90] sm:$0xff]  ;;  %v1560_v54 = vld [vmem:[%s3477_s7 + $0x2f8] sm:$0xff] }
 0x158   :  { %1276 = vmatpush.msra.mxu0 %v733_v52  ;;  %1331 = vmatpush.msra.mxu3 %v434_v55  ;;  %v1966_v23 = vrot.slane %v1819_v38, 7  ;;  %v398_v43 = vld [vmem:[#allocation8 + $0x438] sm:$0xff]  ;;  %v1481_v52 = vld [vmem:[%s3477_s7 + $0x80] sm:$0xff]  ;;  %v863_v38 = vpop.f32.mrf.mxu3 }
 0x159   :  { %1622 = vmatpush.msra.mxu1 %v1474_v49  ;;  %1640 = vmatpush.msra.mxu2 %v1492_v50  ;;  %v1543_v47 = vld [vmem:[%s3477_s7 + $0x270] sm:$0xff] }
 0x15a   :  { %1277 = vmatpush.msra.mxu0 %v729_v58  ;;  %1262 = vmatmul.f32.vlgmr.msrb.gmra.mxu3 %v2739_v36  ;;  %v2846_v30 = vsel %vm1967_vm5, %v1966_v23, %v1818_v19  ;;  %v394_v49 = vld [vmem:[#allocation8 + $0x418] sm:$0xff]  ;;  %v1553_v19 = vld [vmem:[%s3477_s7 + $0x2c0] sm:$0xff] }
 0x15b   :  { %1623 = vmatpush.msra.mxu1 %v1473_v56  ;;  %1641 = vmatpush.msra.mxu2 %v1491_v57  ;;  %v498_v50 = vld [vmem:[#allocation8 + $0x758] sm:$0xff]  ;;  %v1541_v57 = vld [vmem:[%s3477_s7 + $0x260] sm:$0xff] }
 0x15c   :  { %1332 = vmatpush.msra.mxu3 %v430_v20  ;;  %1278 = vmatpush.msra.mxu0 %v725_v63  ;;  %v710_v53 = vld [vmem:[#allocation8 + $0xdf8] sm:$0xff]  ;;  %v823_v63 = vpop.f32.mrf.mxu1 }
 0x15d   :  { %1624 = vmatpush.msra.mxu1 %v1472_v60  ;;  %1642 = vmatpush.msra.mxu2 %v1490_v62  ;;  %v494_v55 = vld [vmem:[#allocation8 + $0x738] sm:$0xff] }
 0x15e   :  { %1333 = vmatpush.msra.mxu3 %v426_v2  ;;  %1279 = vmatpush.msra.mxu0 %v721_v6  ;;  %v706_v56 = vld [vmem:[#allocation8 + $0xdd8] sm:$0xff] }
 0x15f   :  { %1625 = vmatpush.msra.mxu1 %v1471_v3  ;;  %1643 = vmatpush.msra.mxu2 %v1489_v5  ;;  %v1559_v58 = vld [vmem:[%s3477_s7 + $0x2f0] sm:$0xff]  ;;  %v1540_v60 = vld [vmem:[%s3477_s7 + $0x258] sm:$0xff] }
 0x160   :  { %1334 = vmatpush.msra.mxu3 %v422_v8  ;;  %1280 = vmatpush.msra.mxu0 %v717_v12  ;;  %v490_v59 = vld [vmem:[#allocation8 + $0x718] sm:$0xff]  ;;  %v843_v8 = vpop.f32.mrf.mxu2 }
 0x161   :  { %1626 = vmatpush.msra.mxu1 %v1470_v9  ;;  %1644 = vmatpush.msra.mxu2 %v1488_v11  ;;  %v702_v20 = vld [vmem:[#allocation8 + $0xdb8] sm:$0xff]  ;;  %v1537_v9 = vld [vmem:[%s3477_s7 + $0x240] sm:$0xff] }
 0x162   :  { %1335 = vmatpush.msra.mxu3 %v418_v14  ;;  %1281 = vmatpush.msra.mxu0 %v713_v17  ;;  %v486_v61 = vld [vmem:[#allocation8 + $0x6f8] sm:$0xff] }
 0x163   :  { %1627 = vmatpush.msra.mxu1 %v1469_v15  ;;  %1645 = vmatpush.msra.mxu2 %v1487_v16  ;;  %v698_v62 = vld [vmem:[#allocation8 + $0xd98] sm:$0xff]  ;;  %v1554_v15 = vld [vmem:[%s3477_s7 + $0x2c8] sm:$0xff] }
 0x164   :  { %1282 = vmatmul.f32.vlgmr.msra.gmra.mxu0 %v2742_v45  ;;  %1336 = vmatpush.msra.mxu3 %v414_v18  ;;  %v1539_v0 = vld [vmem:[%s3477_s7 + $0x250] sm:$0xff]  ;;  %v1556_v5 = vld [vmem:[%s3477_s7 + $0x2d8] sm:$0xff] }
 0x165   :  { %1346 = vmatpush.msrb.mxu0 %v518_v21  ;;  %1628 = vmatpush.msra.mxu1 %v1468_v22  ;;  %v482_v2 = vld [vmem:[#allocation8 + $0x6d8] sm:$0xff]  ;;  %v777_v21 = vperm.slane %v2913_v13, 0 }
 0x166   :  { %1646 = vmatpush.msra.mxu2 %v1486_v24  ;;  %1337 = vmatpush.msra.mxu3 %v410_v25  ;;  %v694_v3 = vld [vmem:[#allocation8 + $0xd78] sm:$0xff]  ;;  %v2928_v24 = vpop.f32.mrf.mxu1  ;;  %v1534_v25 = vld [vmem:[%s3477_s7 + $0x228] sm:$0xff] }
 0x167   :  { %1347 = vmatpush.msrb.mxu0 %v514_v26  ;;  %1629 = vmatpush.msra.mxu1 %v1467_v29  ;;  %v478_v6 = vld [vmem:[#allocation8 + $0x6b8] sm:$0xff] }
 0x168   :  { %1647 = vmatpush.msra.mxu2 %v1485_v31  ;;  %1338 = vmatpush.msra.mxu3 %v406_v42  ;;  %v690_v7 = vld [vmem:[#allocation8 + $0xd58] sm:$0xff]  ;;  %v1533_v42 = vld [vmem:[%s3477_s7 + $0x220] sm:$0xff] }
 0x169   :  { %1348 = vmatpush.msrb.mxu0 %v510_v32  ;;  %1630 = vmatpush.msra.mxu1 %v1466_v33  ;;  %v1555_v10 = vld [vmem:[%s3477_s7 + $0x2d0] sm:$0xff]  ;;  %v1536_v14 = vld [vmem:[%s3477_s7 + $0x238] sm:$0xff]  ;;  %v824_v33 = vadd.f32 %v823_v63, %v777_v21 }
 0x16a   :  { %1648 = vmatpush.msra.mxu2 %v1484_v34  ;;  %1339 = vmatpush.msra.mxu3 %v402_v35  ;;  %v474_v11 = vld [vmem:[#allocation8 + $0x698] sm:$0xff] }
 0x16b   :  { %1349 = vmatpush.msrb.mxu0 %v506_v39  ;;  %1631 = vmatpush.msra.mxu1 %v1465_v40  ;;  %v686_v12 = vld [vmem:[#allocation8 + $0xd38] sm:$0xff]  ;;  %v883_v39 = vpop.f32.mrf.mxu0  ;;  %v2942_v40 = vpop.f32.mrf.mxu2 }
 0x16c   :  { %1649 = vmatpush.msra.mxu2 %v1483_v41  ;;  %1382 = vmatmul.f32.vlgmr.msrb.gmra.mxu1 %v2722_v37  ;;  %v1542_v37 = vld [vmem:[%s3477_s7 + $0x268] sm:$0xff]  ;;  %v470_v16 = vld [vmem:[#allocation8 + $0x678] sm:$0xff] }
 0x16d   :  { %1696 = vmatpush.msrb.mxu1 %v1544_v28  ;;  %1340 = vmatpush.msra.mxu3 %v398_v43  ;;  %v682_v17 = vld [vmem:[#allocation8 + $0xd18] sm:$0xff]  ;;  %v1550_v43 = vld [vmem:[%s3477_s7 + $0x2a8] sm:$0xff] }
 0x16e   :  { %1350 = vmatpush.msrb.mxu0 %v502_v44  ;;  %1650 = vmatpush.msra.mxu2 %v1482_v46  ;;  %v1535_v18 = vld [vmem:[%s3477_s7 + $0x230] sm:$0xff]  ;;  %v1552_v26 = vld [vmem:[%s3477_s7 + $0x2b8] sm:$0xff] }
 0x16f   :  { %1697 = vmatpush.msrb.mxu1 %v1543_v47  ;;  %1341 = vmatpush.msra.mxu3 %v394_v49  ;;  %v466_v22 = vld [vmem:[#allocation8 + $0x658] sm:$0xff]  ;;  %v844_v49 = vadd.f32 %v843_v8, %v824_v33 }
 0x170   :  { %1351 = vmatpush.msrb.mxu0 %v498_v50  ;;  %1651 = vmatpush.msra.mxu2 %v1481_v52  ;;  %v678_v23 = vld [vmem:[#allocation8 + $0xcf8] sm:$0xff]  ;;  %v1549_v50 = vld [vmem:[%s3477_s7 + $0x2a0] sm:$0xff] }
 0x171   :  { %1402 = vmatmul.f32.vlgmr.msrb.gmra.mxu2 %v2725_v48  ;;  %1406 = vmatpush.msrb.mxu3 %v710_v53  ;;  %v1558_v48 = vld [vmem:[%s3477_s7 + $0x2e8] sm:$0xff]  ;;  %v462_v29 = vld [vmem:[#allocation8 + $0x638] sm:$0xff]  ;;  %v778_v53 = vperm.slane %v2913_v13, 1 }
 0x172   :  { %1698 = vmatpush.msrb.mxu1 %v1542_v37  ;;  %1716 = vmatpush.msrb.mxu2 %v1560_v54  ;;  %v674_v31 = vld [vmem:[#allocation8 + $0xcd8] sm:$0xff]  ;;  %v2957_v37 = vpop.f32.mrf.mxu3 }
 0x173   :  { %1352 = vmatpush.msrb.mxu0 %v494_v55  ;;  %1407 = vmatpush.msrb.mxu3 %v706_v56  ;;  %v1551_v32 = vld [vmem:[%s3477_s7 + $0x2b0] sm:$0xff]  ;;  %v1532_v28 = vld [vmem:[%s3477_s7 + $0x218] sm:$0xff]  ;;  %v1530_v55 = vld [vmem:[%s3477_s7 + $0x208] sm:$0xff]  ;;  %v983_v56 = vpop.f32.mrf.mxu1 }
 0x174   :  { %1699 = vmatpush.msrb.mxu1 %v1541_v57  ;;  %1717 = vmatpush.msrb.mxu2 %v1559_v58  ;;  %v458_v34 = vld [vmem:[#allocation8 + $0x618] sm:$0xff] }
 0x175   :  { %1353 = vmatpush.msrb.mxu0 %v490_v59  ;;  %1408 = vmatpush.msrb.mxu3 %v702_v20  ;;  %v670_v35 = vld [vmem:[#allocation8 + $0xcb8] sm:$0xff]  ;;  %v1529_v20 = vld [vmem:[%s3477_s7 + $0x200] sm:$0xff] }
 0x176   :  { %1700 = vmatpush.msrb.mxu1 %v1540_v60  ;;  %1718 = vmatpush.msrb.mxu2 %v1558_v48  ;;  %v774_v41 = vld [vmem:[#allocation8 + $0xff8] sm:$0xff]  ;;  %v864_v60 = vadd.f32 %v863_v38, %v844_v49 }
 0x177   :  { %1354 = vmatpush.msrb.mxu0 %v486_v61  ;;  %1409 = vmatpush.msrb.mxu3 %v698_v62  ;;  %v666_v44 = vld [vmem:[#allocation8 + $0xc98] sm:$0xff]  ;;  %v1600_v61 = vld.sshfl [vmem:[#allocation1] sm:$0xff pattern:$0x73625140]  ;;  %v984_v62 = vadd.f32 %v983_v56, %v778_v53  ;;  %v1506_v56 = vld [vmem:[%s3477_s7 + $0x148] sm:$0xff] }
 0x178   :  { %1701 = vmatpush.msrb.mxu1 %v1539_v0  ;;  %1719 = vmatpush.msrb.mxu2 %v1557_v1  ;;  %v770_v46 = vld [vmem:[#allocation8 + $0xfd8] sm:$0xff]  ;;  %v1003_v1 = vpop.f32.mrf.mxu2 }
 0x179   :  { %1355 = vmatpush.msrb.mxu0 %v482_v2  ;;  %1410 = vmatpush.msrb.mxu3 %v694_v3  ;;  %v1531_v47 = vld [vmem:[%s3477_s7 + $0x210] sm:$0xff]  ;;  %v1548_v57 = vld [vmem:[%s3477_s7 + $0x298] sm:$0xff]  ;;  %v1546_v3 = vld [vmem:[%s3477_s7 + $0x288] sm:$0xff] }
 0x17a   :  { %1702 = vmatpush.msrb.mxu1 %v1538_v4  ;;  %1720 = vmatpush.msrb.mxu2 %v1556_v5  ;;  %v662_v52 = vld [vmem:[#allocation8 + $0xc78] sm:$0xff]  ;;  %v2977_v4 = vpop.f32.mrf.mxu0 }
 0x17b   :  { %1356 = vmatpush.msrb.mxu0 %v478_v6  ;;  %1411 = vmatpush.msrb.mxu3 %v690_v7  ;;  %v766_v54 = vld [vmem:[#allocation8 + $0xfb8] sm:$0xff]  ;;  %v884_v7 = vadd.f32 %v883_v39, %v864_v60 }
 0x17c   :  { %1703 = vmatpush.msrb.mxu1 %v1537_v9  ;;  %1721 = vmatpush.msrb.mxu2 %v1555_v10  ;;  %v658_v58 = vld [vmem:[#allocation8 + $0xc58] sm:$0xff]  ;;  %v1545_v9 = vld [vmem:[%s3477_s7 + $0x280] sm:$0xff]  ;;  %v1004_v10 = vadd.f32 %v1003_v1, %v984_v62 }
 0x17d   :  { %1357 = vmatpush.msrb.mxu0 %v474_v11  ;;  %1412 = vmatpush.msrb.mxu3 %v686_v12  ;;  %v762_v59 = vld [vmem:[#allocation8 + $0xf98] sm:$0xff]  ;;  %v1601_v11 = vld.sshfl [vmem:[#allocation1 + $0x8] sm:$0xff pattern:$0x73625140]  ;;  %v904_v38 = vadd.f32 %v2928_v24, %v884_v7 }
 0x17e   :  { %1704 = vmatpush.msrb.mxu1 %v1536_v14  ;;  %1722 = vmatpush.msrb.mxu2 %v1554_v15  ;;  %v1547_v48 = vld [vmem:[%s3477_s7 + $0x290] sm:$0xff]  ;;  %v1835_v63 = vld [vmem:[%s3479_s9 + $0x78] sm:$0xff]  ;;  %v1833_v15 = vld [vmem:[%s3479_s9 + $0x68] sm:$0xff] }
 0x17f   :  { %1358 = vmatpush.msrb.mxu0 %v470_v16  ;;  %1413 = vmatpush.msrb.mxu3 %v682_v17  ;;  %v654_v0 = vld [vmem:[#allocation8 + $0xc38] sm:$0xff]  ;;  %v1023_v12 = vpop.f32.mrf.mxu3  ;;  %v1604_v7 = vld.sshfl [vmem:[#allocation1 + $0x20] sm:$0xff pattern:$0x73625140] }
 0x180   :  { %1705 = vmatpush.msrb.mxu1 %v1535_v18  ;;  %1723 = vmatpush.msrb.mxu2 %v1553_v19  ;;  %v758_v2 = vld [vmem:[#allocation8 + $0xf78] sm:$0xff]  ;;  %v1832_v19 = vld [vmem:[%s3479_s9 + $0x60] sm:$0xff]  ;;  %v1024_v21 = vadd.f32 %v1023_v12, %v1004_v10 }
 0x181   :  { %1359 = vmatpush.msrb.mxu0 %v466_v22  ;;  %1414 = vmatpush.msrb.mxu3 %v678_v23  ;;  %v1834_v5 = vld [vmem:[%s3479_s9 + $0x70] sm:$0xff]  ;;  %v1512_v14 = vld [vmem:[%s3477_s7 + $0x178] sm:$0xff] }
 0x182   :  { %1706 = vmatpush.msrb.mxu1 %v1534_v25  ;;  %1724 = vmatpush.msrb.mxu2 %v1552_v26  ;;  %v650_v6 = vld [vmem:[#allocation8 + $0xc18] sm:$0xff]  ;;  %v1849_v25 = vld [vmem:[%s3479_s9 + $0xe8] sm:$0xff] }
 0x183   :  { %1360 = vmatpush.msrb.mxu0 %v462_v29  ;;  %1415 = vmatpush.msrb.mxu3 %v674_v31  ;;  %v754_v8 = vld [vmem:[#allocation8 + $0xf58] sm:$0xff]  ;;  %v1063_v31 = vpop.f32.mrf.mxu1 }
 0x184   :  { %1707 = vmatpush.msrb.mxu1 %v1533_v42  ;;  %1725 = vmatpush.msrb.mxu2 %v1551_v32  ;;  %v1851_v16 = vld [vmem:[%s3479_s9 + $0xf8] sm:$0xff]  ;;  %v1511_v18 = vld [vmem:[%s3477_s7 + $0x170] sm:$0xff]  ;;  %v924_v42 = vadd.f32 %v2942_v40, %v904_v38  ;;  %v1509_v32 = vld [vmem:[%s3477_s7 + $0x160] sm:$0xff] }
 0x185   :  { %1361 = vmatpush.msrb.mxu0 %v458_v34  ;;  %1416 = vmatpush.msrb.mxu3 %v670_v35  ;;  %v750_v17 = vld [vmem:[#allocation8 + $0xf38] sm:$0xff]  ;;  %v1848_v35 = vld [vmem:[%s3479_s9 + $0xe0] sm:$0xff] }
 0x186   :  { %1708 = vmatpush.msrb.mxu1 %v1532_v28  ;;  %1726 = vmatpush.msrb.mxu2 %v1550_v43  ;;  %v1850_v22 = vld [vmem:[%s3479_s9 + $0xf0] sm:$0xff]  ;;  %v1831_v24 = vld [vmem:[%s3479_s9 + $0x58] sm:$0xff]  ;;  %v1829_v28 = vld [vmem:[%s3479_s9 + $0x48] sm:$0xff]  ;;  %v944_v49 = vadd.f32 %v2957_v37, %v924_v42 }
 0x187   :  { %1426 = vmatpush.msra.mxu0 %v774_v41  ;;  %1417 = vmatpush.msrb.mxu3 %v666_v44  ;;  %v746_v23 = vld [vmem:[#allocation8 + $0xf18] sm:$0xff]  ;;  %v1083_v41 = vpop.f32.mrf.mxu2 }
 0x188   :  { %1709 = vmatpush.msrb.mxu1 %v1531_v47  ;;  %1727 = vmatpush.msrb.mxu2 %v1549_v50  ;;  %v742_v26 = vld [vmem:[#allocation8 + $0xef8] sm:$0xff] }
 0x189   :  { %1427 = vmatpush.msra.mxu0 %v770_v46  ;;  %1418 = vmatpush.msrb.mxu3 %v662_v52  ;;  %v1830_v33 = vld [vmem:[%s3479_s9 + $0x50] sm:$0xff]  ;;  %v1508_v40 = vld [vmem:[%s3477_s7 + $0x158] sm:$0xff]  ;;  %v1828_v52 = vld [vmem:[%s3479_s9 + $0x40] sm:$0xff] }
 0x18a   :  { %1710 = vmatpush.msrb.mxu1 %v1530_v55  ;;  %1728 = vmatpush.msrb.mxu2 %v1548_v57  ;;  %v738_v39 = vld [vmem:[#allocation8 + $0xed8] sm:$0xff] }
 0x18b   :  { %1428 = vmatpush.msra.mxu0 %v766_v54  ;;  %1419 = vmatpush.msrb.mxu3 %v658_v58  ;;  %v1847_v44 = vld [vmem:[%s3479_s9 + $0xd8] sm:$0xff]  ;;  %v1507_v50 = vld [vmem:[%s3477_s7 + $0x150] sm:$0xff] }
 0x18c   :  { %1711 = vmatpush.msrb.mxu1 %v1529_v20  ;;  %1729 = vmatpush.msrb.mxu2 %v1547_v48  ;;  %v734_v46 = vld [vmem:[#allocation8 + $0xeb8] sm:$0xff]  ;;  %v1845_v20 = vld [vmem:[%s3479_s9 + $0xc8] sm:$0xff] }
 0x18d   :  { %1429 = vmatpush.msra.mxu0 %v762_v59  ;;  %1632 = vmatmul.f32.vlgmr.msra.gmra.mxu1 %v1600_v61  ;;  %v1846_v54 = vld [vmem:[%s3479_s9 + $0xd0] sm:$0xff]  ;;  %v1827_v57 = vld [vmem:[%s3479_s9 + $0x38] sm:$0xff]  ;;  %v964_v59 = vadd.f32 %v2977_v4, %v944_v49  ;;  %v1505_v61 = vld [vmem:[%s3477_s7 + $0x140] sm:$0xff] }
 0x18e   :  { %1884 = vmatpush.msra.mxu1 %v1835_v63  ;;  %1420 = vmatpush.msrb.mxu3 %v654_v0  ;;  %v730_v55 = vld [vmem:[#allocation8 + $0xe98] sm:$0xff]  ;;  %v1844_v63 = vld [vmem:[%s3479_s9 + $0xc0] sm:$0xff]  ;;  %v1522_v49 = vld [vmem:[%s3477_s7 + $0x1c8] sm:$0xff] }
 0x18f   :  { %1430 = vmatpush.msra.mxu0 %v758_v2  ;;  %1730 = vmatpush.msrb.mxu2 %v1546_v3  ;;  %v1103_v47 = vpop.f32.mrf.mxu3  ;;  %v726_v60 = vld [vmem:[#allocation8 + $0xe78] sm:$0xff]  ;;  %v1824_v4 = vld [vmem:[%s3479_s9 + $0x20] sm:$0xff] }
 0x190   :  { %1885 = vmatpush.msra.mxu1 %v1834_v5  ;;  %1421 = vmatpush.msrb.mxu3 %v650_v6  ;;  %v1826_v62 = vld [vmem:[%s3479_s9 + $0x30] sm:$0xff]  ;;  %v1843_v1 = vld [vmem:[%s3479_s9 + $0xb8] sm:$0xff] }
 0x191   :  { %1431 = vmatpush.msra.mxu0 %v754_v8  ;;  %1731 = vmatpush.msrb.mxu2 %v1545_v9  ;;  %v722_v0 = vld [vmem:[#allocation8 + $0xe58] sm:$0xff]  ;;  %v1502_v9 = vld [vmem:[%s3477_s7 + $0x128] sm:$0xff] }
 0x192   :  { %1342 = vmatmul.f32.vlgmr.msra.gmra.mxu3 %v2730_v51  ;;  %1652 = vmatmul.f32.vlgmr.msra.gmra.mxu2 %v1601_v11  ;;  %v1510_v51 = vld [vmem:[%s3477_s7 + $0x168] sm:$0xff]  ;;  %v718_v2 = vld [vmem:[#allocation8 + $0xe38] sm:$0xff] }
 0x193   :  { %1656 = vmatpush.msra.mxu3 %v1512_v14  ;;  %1886 = vmatpush.msra.mxu1 %v1833_v15  ;;  %v1503_v3 = vld [vmem:[%s3477_s7 + $0x130] sm:$0xff]  ;;  %v1823_v10 = vld [vmem:[%s3479_s9 + $0x18] sm:$0xff]  ;;  %v1841_v11 = vld [vmem:[%s3479_s9 + $0xa8] sm:$0xff] }
 0x194   :  { %1904 = vmatpush.msra.mxu2 %v1851_v16  ;;  %1432 = vmatpush.msra.mxu0 %v750_v17  ;;  %v1842_v5 = vld [vmem:[%s3479_s9 + $0xb0] sm:$0xff]  ;;  %v1501_v15 = vld [vmem:[%s3477_s7 + $0x120] sm:$0xff] }
 0x195   :  { %1657 = vmatpush.msra.mxu3 %v1511_v18  ;;  %1887 = vmatpush.msra.mxu1 %v1832_v19  ;;  %v1043_v29 = vpop.f32.mrf.mxu0  ;;  %v714_v6 = vld [vmem:[#allocation8 + $0xe18] sm:$0xff]  ;;  %v1840_v17 = vld [vmem:[%s3479_s9 + $0xa0] sm:$0xff]  ;;  %v1605_v18 = vld.sshfl [vmem:[#allocation1 + $0x28] sm:$0xff pattern:$0x73625140] }
 0x196   :  { %1905 = vmatpush.msra.mxu2 %v1850_v22  ;;  %1433 = vmatpush.msra.mxu0 %v746_v23  ;;  %v1044_v34 = vadd.f32 %v1043_v29, %v1024_v21  ;;  %v1822_v16 = vld [vmem:[%s3479_s9 + $0x10] sm:$0xff]  ;;  %v1821_v19 = vld [vmem:[%s3479_s9 + $0x8] sm:$0xff]  ;;  %v1839_v21 = vld [vmem:[%s3479_s9 + $0x98] sm:$0xff] }
 0x197   :  { %1658 = vmatpush.msra.mxu3 %v1510_v51  ;;  %1888 = vmatpush.msra.mxu1 %v1831_v24  ;;  %v1499_v22 = vld [vmem:[%s3477_s7 + $0x110] sm:$0xff]  ;;  %v1820_v23 = vld [vmem:[%s3479_s9] sm:$0xff]  ;;  %v1498_v24 = vld [vmem:[%s3477_s7 + $0x108] sm:$0xff] }
 0x198   :  { %1906 = vmatpush.msra.mxu2 %v1849_v25  ;;  %1434 = vmatpush.msra.mxu0 %v742_v26  ;;  %v1064_v43 = vadd.f32 %v1063_v31, %v1044_v34  ;;  %v1838_v51 = vld [vmem:[%s3479_s9 + $0x90] sm:$0xff]  ;;  %v1837_v25 = vld [vmem:[%s3479_s9 + $0x88] sm:$0xff]  ;;  %v1497_v26 = vld [vmem:[%s3477_s7 + $0x100] sm:$0xff] }
 0x199   :  { %1659 = vmatpush.msra.mxu3 %v1509_v32  ;;  %1889 = vmatpush.msra.mxu1 %v1830_v33  ;;  %v1836_v29 = vld [vmem:[%s3479_s9 + $0x80] sm:$0xff]  ;;  %v1576_v31 = vld [vmem:[%s3477_s7 + $0x378] sm:$0xff]  ;;  %v1602_v42 = vld.sshfl [vmem:[#allocation1 + $0x10] sm:$0xff pattern:$0x73625140] }
 0x19a   :  { %1907 = vmatpush.msra.mxu2 %v1848_v35  ;;  %1435 = vmatpush.msra.mxu0 %v738_v39  ;;  %v1084_v53 = vadd.f32 %v1083_v41, %v1064_v43  ;;  %v1528_v32 = vld [vmem:[%s3477_s7 + $0x1f8] sm:$0xff]  ;;  %v1575_v33 = vld [vmem:[%s3477_s7 + $0x370] sm:$0xff]  ;;  %v1574_v35 = vld [vmem:[%s3477_s7 + $0x368] sm:$0xff] }
 0x19b   :  { %1660 = vmatpush.msra.mxu3 %v1508_v40  ;;  %1890 = vmatpush.msra.mxu1 %v1829_v28  ;;  %v1527_v34 = vld [vmem:[%s3477_s7 + $0x1f0] sm:$0xff]  ;;  %v1526_v39 = vld [vmem:[%s3477_s7 + $0x1e8] sm:$0xff]  ;;  %v1573_v41 = vld [vmem:[%s3477_s7 + $0x360] sm:$0xff] }
 0x19c   :  { %1908 = vmatpush.msra.mxu2 %v1847_v44  ;;  %1436 = vmatpush.msra.mxu0 %v734_v46  ;;  %v1104_v37 = vadd.f32 %v1103_v47, %v1084_v53  ;;  %v1525_v40 = vld [vmem:[%s3477_s7 + $0x1e0] sm:$0xff]  ;;  %v1572_v28 = vld [vmem:[%s3477_s7 + $0x358] sm:$0xff]  ;;  %v1571_v44 = vld [vmem:[%s3477_s7 + $0x350] sm:$0xff] }
 0x19d   :  { %1661 = vmatpush.msra.mxu3 %v1507_v50  ;;  %1891 = vmatpush.msra.mxu1 %v1828_v52  ;;  %v1524_v43 = vld [vmem:[%s3477_s7 + $0x1d8] sm:$0xff]  ;;  %v1523_v46 = vld [vmem:[%s3477_s7 + $0x1d0] sm:$0xff]  ;;  %v1570_v47 = vld [vmem:[%s3477_s7 + $0x348] sm:$0xff] }
 0x19e   :  { %1909 = vmatpush.msra.mxu2 %v1846_v54  ;;  %1437 = vmatpush.msra.mxu0 %v730_v55  ;;  %v1569_v50 = vld [vmem:[%s3477_s7 + $0x340] sm:$0xff]  ;;  %v1568_v53 = vld [vmem:[%s3477_s7 + $0x338] sm:$0xff]  ;;  %v1567_v55 = vld [vmem:[%s3477_s7 + $0x330] sm:$0xff] }
 0x19f   :  { %v1123_v58 = vpop.f32.mrf.mxu0  ;;  %1362 = vmatmul.f32.vlgmr.msrb.gmra.mxu0 %v2735_v27  ;;  %1422 = vmatmul.f32.vlgmr.msrb.gmra.mxu3 %v2739_v36  ;;  %v1504_v27 = vld [vmem:[%s3477_s7 + $0x138] sm:$0xff]  ;;  %v1825_v36 = vld [vmem:[%s3479_s9 + $0x28] sm:$0xff]  ;;  %v1521_v52 = vld [vmem:[%s3477_s7 + $0x1c0] sm:$0xff] }
 0x1a0   :  { %v1124_v48 = vadd.f32 %v1123_v58, %v1104_v37  ;;  %1662 = vmatpush.msra.mxu3 %v1506_v56  ;;  %1892 = vmatpush.msra.mxu1 %v1827_v57  ;;  %v1520_v54 = vld [vmem:[%s3477_s7 + $0x1b8] sm:$0xff]  ;;  %v1519_v37 = vld [vmem:[%s3477_s7 + $0x1b0] sm:$0xff]  ;;  %v1566_v56 = vld [vmem:[%s3477_s7 + $0x328] sm:$0xff] }
 0x1a1   :  { %1910 = vmatpush.msra.mxu2 %v1845_v20  ;;  %1438 = vmatpush.msra.mxu0 %v726_v60  ;;  %v1518_v57 = vld [vmem:[%s3477_s7 + $0x1a8] sm:$0xff]  ;;  %v1565_v58 = vld [vmem:[%s3477_s7 + $0x320] sm:$0xff]  ;;  %v779_v20 = vperm.slane %v2913_v13, 2 }
 0x1a2   :  { %2194 = vtanh.f32 %v1124_v48  ;;  %1663 = vmatpush.msra.mxu3 %v1505_v61  ;;  %1893 = vmatpush.msra.mxu1 %v1826_v62  ;;  %v1517_v60 = vld [vmem:[%s3477_s7 + $0x1a0] sm:$0xff]  ;;  %v1143_v48 = vpop.f32.mrf.mxu1  ;;  %v1563_v61 = vld [vmem:[%s3477_s7 + $0x310] sm:$0xff]  ;;  %v1516_v62 = vld [vmem:[%s3477_s7 + $0x198] sm:$0xff] }
 0x1a3   :  { %2196 = vtanh.f32 %v964_v59  ;;  %1911 = vmatpush.msra.mxu2 %v1844_v63  ;;  %1439 = vmatpush.msra.mxu0 %v722_v0  ;;  %v1564_v59 = vld [vmem:[%s3477_s7 + $0x318] sm:$0xff]  ;;  %v1515_v63 = vld [vmem:[%s3477_s7 + $0x190] sm:$0xff]  ;;  %v1562_v0 = vld [vmem:[%s3477_s7 + $0x308] sm:$0xff] }
 0x1a4   :  { %1664 = vmatpush.msra.mxu3 %v1504_v27  ;;  %1894 = vmatpush.msra.mxu1 %v1825_v36  ;;  %v1144_v27 = vadd.f32 %v1143_v48, %v779_v20  ;;  %v1514_v36 = vld [vmem:[%s3477_s7 + $0x188] sm:$0xff]  ;;  %v1607_v20 = vld.sshfl [vmem:[#allocation1 + $0x38] sm:$0xff pattern:$0x73625140] }
 0x1a5   :  { %1912 = vmatpush.msra.mxu2 %v1843_v1  ;;  %1440 = vmatpush.msra.mxu0 %v718_v2  ;;  %v1163_v1 = vpop.f32.mrf.mxu2  ;;  %v1561_v2 = vld [vmem:[%s3477_s7 + $0x300] sm:$0xff]  ;;  %v1881_v48 = vld [vmem:[%s3479_s9 + $0x1e8] sm:$0xff] }
 0x1a6   :  { %1665 = vmatpush.msra.mxu3 %v1503_v3  ;;  %1895 = vmatpush.msra.mxu1 %v1824_v4  ;;  %v1513_v3 = vld [vmem:[%s3477_s7 + $0x180] sm:$0xff]  ;;  %v1867_v4 = vld [vmem:[%s3479_s9 + $0x178] sm:$0xff] }
 0x1a7   :  { %1913 = vmatpush.msra.mxu2 %v1842_v5  ;;  %1441 = vmatpush.msra.mxu0 %v714_v6  ;;  %v1164_v5 = vadd.f32 %v1163_v1, %v1144_v27  ;;  %v1606_v6 = vld.sshfl [vmem:[#allocation1 + $0x30] sm:$0xff pattern:$0x73625140]  ;;  %v1876_v27 = vld [vmem:[%s3479_s9 + $0x1c0] sm:$0xff] }
 0x1a8   :  { %v2195_v8 = vpop.eup %2194  ;;  %1712 = vmatmul.f32.vlgmr.msrb.gmra.mxu1 %v1604_v7  ;;  %1442 = vmatmul.f32.vlgmr.msra.gmra.mxu0 %v2742_v45  ;;  %v1500_v45 = vld [vmem:[%s3477_s7 + $0x118] sm:$0xff]  ;;  %v1874_v1 = vld [vmem:[%s3479_s9 + $0x1b0] sm:$0xff] }
 0x1a9   :  { %v1454_v12 = vrot.slane %v2195_v8, 6  ;;  %v2197_v14 = vpop.eup %2196  ;;  %1666 = vmatpush.msra.mxu3 %v1502_v9  ;;  %1896 = vmatpush.msra.mxu1 %v1823_v10  ;;  %v1592_v7 = vld [vmem:[%s3477_s7 + $0x3f8] sm:$0xff]  ;;  %v1591_v10 = vld [vmem:[%s3477_s7 + $0x3f0] sm:$0xff] }
 0x1aa   :  { %1914 = vmatpush.msra.mxu2 %v1841_v11  ;;  %1676 = vmatpush.msrb.mxu0 %v1528_v32  ;;  %v1865_v11 = vld [vmem:[%s3479_s9 + $0x168] sm:$0xff] }
 0x1ab   :  { %v3101_v38 = vsel %vm1457_vm6, %v2197_v14, %v1454_v12  ;;  %1667 = vmatpush.msra.mxu3 %v1501_v15  ;;  %1897 = vmatpush.msra.mxu1 %v1822_v16  ;;  %v1590_v12 = vld [vmem:[%s3477_s7 + $0x3e8] sm:$0xff]  ;;  %v1864_v15 = vld [vmem:[%s3479_s9 + $0x160] sm:$0xff] }
 0x1ac   :  { %1915 = vmatpush.msra.mxu2 %v1840_v17  ;;  %1677 = vmatpush.msrb.mxu0 %v1527_v34  ;;  %v1589_v16 = vld [vmem:[%s3477_s7 + $0x3e0] sm:$0xff]  ;;  %v1603_v17 = vld.sshfl [vmem:[#allocation1 + $0x18] sm:$0xff pattern:$0x73625140] }
 0x1ad   :  { %1732 = vmatmul.f32.vlgmr.msrb.gmra.mxu2 %v1605_v18  ;;  %1668 = vmatpush.msra.mxu3 %v1500_v45  ;;  %v1863_v18 = vld [vmem:[%s3479_s9 + $0x158] sm:$0xff] }
 0x1ae   :  { %1898 = vmatpush.msra.mxu1 %v1821_v19  ;;  %1916 = vmatpush.msra.mxu2 %v1839_v21  ;;  %v1223_v19 = vpop.f32.mrf.mxu1  ;;  %v1588_v21 = vld [vmem:[%s3477_s7 + $0x3d8] sm:$0xff] }
 0x1af   :  { %1669 = vmatpush.msra.mxu3 %v1499_v22  ;;  %1678 = vmatpush.msrb.mxu0 %v1526_v39  ;;  %v1859_v34 = vld [vmem:[%s3479_s9 + $0x138] sm:$0xff] }
 0x1b0   :  { %1899 = vmatpush.msra.mxu1 %v1820_v23  ;;  %1917 = vmatpush.msra.mxu2 %v1838_v51  ;;  %v1862_v23 = vld [vmem:[%s3479_s9 + $0x150] sm:$0xff] }
 0x1b1   :  { %1900 = vmatmul.f32.vlgmr.msra.gmra.mxu1 %v2197_v14  ;;  %1670 = vmatpush.msra.mxu3 %v1498_v24  ;;  %v1587_v24 = vld [vmem:[%s3477_s7 + $0x3d0] sm:$0xff] }
 0x1b2   :  { %1918 = vmatpush.msra.mxu2 %v1837_v25  ;;  %1679 = vmatpush.msrb.mxu0 %v1525_v40  ;;  %v1243_v51 = vpop.f32.mrf.mxu2 }
 0x1b3   :  { %1671 = vmatpush.msra.mxu3 %v1497_v26  ;;  %v1861_v26 = vld [vmem:[%s3479_s9 + $0x148] sm:$0xff] }
 0x1b4   :  { %1919 = vmatpush.msra.mxu2 %v1836_v29  ;;  %1672 = vmatmul.f32.vlgmr.msra.gmra.mxu3 %v1602_v42  ;;  %v1586_v29 = vld [vmem:[%s3477_s7 + $0x3c8] sm:$0xff]  ;;  %v1860_v42 = vld [vmem:[%s3479_s9 + $0x140] sm:$0xff] }
 0x1b5   :  { %1736 = vmatpush.msrb.mxu3 %v1576_v31  ;;  %1920 = vmatmul.f32.vlgmr.msra.gmra.mxu2 %v2195_v8  ;;  %v1866_v8 = vld [vmem:[%s3479_s9 + $0x170] sm:$0xff] }
 0x1b6   :  { %1680 = vmatpush.msrb.mxu0 %v1524_v43  ;;  %v1857_v43 = vld [vmem:[%s3479_s9 + $0x128] sm:$0xff] }
 0x1b7   :  { %1737 = vmatpush.msrb.mxu3 %v1575_v33  ;;  %v1585_v33 = vld [vmem:[%s3477_s7 + $0x3c0] sm:$0xff] }
 0x1b8   :  { %1681 = vmatpush.msrb.mxu0 %v1523_v46 }
 0x1b9   :  { %1738 = vmatpush.msrb.mxu3 %v1574_v35  ;;  %v1584_v35 = vld [vmem:[%s3477_s7 + $0x3b8] sm:$0xff] }
 0x1ba   :  { %1682 = vmatpush.msrb.mxu0 %v1522_v49  ;;  %v1581_v49 = vld [vmem:[%s3477_s7 + $0x3a0] sm:$0xff] }
 0x1bb   :  { %1739 = vmatpush.msrb.mxu3 %v1573_v41  ;;  %v1858_v41 = vld [vmem:[%s3479_s9 + $0x130] sm:$0xff] }
 0x1bc   :  { %1683 = vmatpush.msrb.mxu0 %v1521_v52  ;;  %v1580_v52 = vld [vmem:[%s3477_s7 + $0x398] sm:$0xff] }
 0x1bd   :  { %1740 = vmatpush.msrb.mxu3 %v1572_v28  ;;  %v1583_v28 = vld [vmem:[%s3477_s7 + $0x3b0] sm:$0xff] }
 0x1be   :  { %1684 = vmatpush.msrb.mxu0 %v1520_v54  ;;  %v1579_v54 = vld [vmem:[%s3477_s7 + $0x390] sm:$0xff] }
 0x1bf   :  { %1741 = vmatpush.msrb.mxu3 %v1571_v44  ;;  %v1582_v44 = vld [vmem:[%s3477_s7 + $0x3a8] sm:$0xff] }
 0x1c0   :  { %1685 = vmatpush.msrb.mxu0 %v1519_v37  ;;  %v1578_v37 = vld [vmem:[%s3477_s7 + $0x388] sm:$0xff] }
 0x1c1   :  { %1742 = vmatpush.msrb.mxu3 %v1570_v47  ;;  %v1856_v47 = vld [vmem:[%s3479_s9 + $0x120] sm:$0xff] }
 0x1c2   :  { %1686 = vmatpush.msrb.mxu0 %v1518_v57  ;;  %v1577_v57 = vld [vmem:[%s3477_s7 + $0x380] sm:$0xff] }
 0x1c3   :  { %1743 = vmatpush.msrb.mxu3 %v1569_v50  ;;  %v1855_v50 = vld [vmem:[%s3479_s9 + $0x118] sm:$0xff] }
 0x1c4   :  { %1687 = vmatpush.msrb.mxu0 %v1517_v60  ;;  %v1882_v60 = vld [vmem:[%s3479_s9 + $0x1f0] sm:$0xff] }
 0x1c5   :  { %1744 = vmatpush.msrb.mxu3 %v1568_v53  ;;  %v1854_v53 = vld [vmem:[%s3479_s9 + $0x110] sm:$0xff] }
 0x1c6   :  { %1688 = vmatpush.msrb.mxu0 %v1516_v62  ;;  %v1203_v45 = vpop.f32.mrf.mxu0  ;;  %v1879_v62 = vld [vmem:[%s3479_s9 + $0x1d8] sm:$0xff] }
 0x1c7   :  { %1745 = vmatpush.msrb.mxu3 %v1567_v55  ;;  %v1853_v55 = vld [vmem:[%s3479_s9 + $0x108] sm:$0xff] }
 0x1c8   :  { %1689 = vmatpush.msrb.mxu0 %v1515_v63  ;;  %v1183_v9 = vpop.f32.mrf.mxu3  ;;  %v1878_v63 = vld [vmem:[%s3479_s9 + $0x1d0] sm:$0xff] }
 0x1c9   :  { %1746 = vmatpush.msrb.mxu3 %v1566_v56  ;;  %v1184_v14 = vadd.f32 %v1183_v9, %v1164_v5  ;;  %v1852_v56 = vld [vmem:[%s3479_s9 + $0x100] sm:$0xff]  ;;  %v1870_v5 = vld [vmem:[%s3479_s9 + $0x190] sm:$0xff]  ;;  %v1303_v9 = vpop.f32.mrf.mxu1 }
 0x1ca   :  { %1690 = vmatpush.msrb.mxu0 %v1514_v36  ;;  %v1875_v36 = vld [vmem:[%s3479_s9 + $0x1b8] sm:$0xff] }
 0x1cb   :  { %1747 = vmatpush.msrb.mxu3 %v1565_v58  ;;  %v1204_v22 = vadd.f32 %v1203_v45, %v1184_v14 }
 0x1cc   :  { %1691 = vmatpush.msrb.mxu0 %v1513_v3  ;;  %v1872_v3 = vld [vmem:[%s3479_s9 + $0x1a0] sm:$0xff] }
 0x1cd   :  { %1748 = vmatpush.msrb.mxu3 %v1564_v59  ;;  %1692 = vmatmul.f32.vlgmr.msrb.gmra.mxu0 %v1603_v17  ;;  %v1224_v25 = vadd.f32 %v1223_v19, %v1204_v22  ;;  %v1883_v59 = vld [vmem:[%s3479_s9 + $0x1f8] sm:$0xff] }
 0x1ce   :  { %1756 = vmatpush.msra.mxu0 %v1592_v7  ;;  %v1869_v7 = vld [vmem:[%s3479_s9 + $0x188] sm:$0xff] }
 0x1cf   :  { %1749 = vmatpush.msrb.mxu3 %v1563_v61  ;;  %v1244_v31 = vadd.f32 %v1243_v51, %v1224_v25  ;;  %v1880_v61 = vld [vmem:[%s3479_s9 + $0x1e0] sm:$0xff] }
 0x1d0   :  { %1757 = vmatpush.msra.mxu0 %v1591_v10 }
 0x1d1   :  { %1750 = vmatpush.msrb.mxu3 %v1562_v0  ;;  %v1877_v0 = vld [vmem:[%s3479_s9 + $0x1c8] sm:$0xff] }
 0x1d2   :  { %1758 = vmatpush.msra.mxu0 %v1590_v12 }
 0x1d3   :  { %1751 = vmatpush.msrb.mxu3 %v1561_v2  ;;  %v1873_v2 = vld [vmem:[%s3479_s9 + $0x1a8] sm:$0xff] }
 0x1d4   :  { %1752 = vmatmul.f32.vlgmr.msrb.gmra.mxu3 %v1606_v6  ;;  %1759 = vmatpush.msra.mxu0 %v1589_v16  ;;  %v780_v6 = vperm.slane %v2913_v13, 3 }
 0x1d5   :  { %1924 = vmatpush.msra.mxu3 %v1867_v4  ;;  %v1871_v4 = vld [vmem:[%s3479_s9 + $0x198] sm:$0xff] }
 0x1d6   :  { %1760 = vmatpush.msra.mxu0 %v1588_v21  ;;  %v1304_v10 = vadd.f32 %v1303_v9, %v780_v6  ;;  %v1983_v6 = vld [vmem:[%s3480_s10 + $0x8] sm:$0xff]  ;;  %v2025_v9 = vld [vmem:[#allocation14 + $0x10] sm:$0xff] }
 0x1d7   :  { %1925 = vmatpush.msra.mxu3 %v1866_v8  ;;  %v1868_v8 = vld [vmem:[%s3479_s9 + $0x180] sm:$0xff]  ;;  %s2546_s9 = smov 64  }
 0x1d8   :  { %1761 = vmatpush.msra.mxu0 %v1587_v24 }
 0x1d9   :  { %1926 = vmatpush.msra.mxu3 %v1865_v11  ;;  %v1323_v11 = vpop.f32.mrf.mxu2 }
 0x1da   :  { %1762 = vmatpush.msra.mxu0 %v1586_v29  ;;  %v1324_v12 = vadd.f32 %v1323_v11, %v1304_v10 }
 0x1db   :  { %1927 = vmatpush.msra.mxu3 %v1864_v15 }
 0x1dc   :  { %1763 = vmatpush.msra.mxu0 %v1585_v33 }
 0x1dd   :  { %1928 = vmatpush.msra.mxu3 %v1863_v18  ;;  %v1263_v32 = vpop.f32.mrf.mxu3 }
 0x1de   :  { %v1264_v39 = vadd.f32 %v1263_v32, %v1244_v31  ;;  %1764 = vmatpush.msra.mxu0 %v1584_v35 }
 0x1df   :  { %1929 = vmatpush.msra.mxu3 %v1862_v23 }
 0x1e0   :  { %1765 = vmatpush.msra.mxu0 %v1583_v28 }
 0x1e1   :  { %1930 = vmatpush.msra.mxu3 %v1861_v26  ;;  %v1283_v40 = vpop.f32.mrf.mxu0 }
 0x1e2   :  { %v1284_v46 = vadd.f32 %v1283_v40, %v1264_v39  ;;  %1766 = vmatpush.msra.mxu0 %v1582_v44 }
 0x1e3   :  { %1931 = vmatpush.msra.mxu3 %v1860_v42  ;;  %v2184_v42 = vld [vmem:[#allocation11] ss:$0 sm:$0xff] }
 0x1e4   :  { %2198 = vtanh.f32 %v1284_v46  ;;  %1767 = vmatpush.msra.mxu0 %v1581_v49 }
 0x1e5   :  { %1932 = vmatpush.msra.mxu3 %v1859_v34 }
 0x1e6   :  { %1768 = vmatpush.msra.mxu0 %v1580_v52 }
 0x1e7   :  { %1933 = vmatpush.msra.mxu3 %v1858_v41 }
 0x1e8   :  { %1769 = vmatpush.msra.mxu0 %v1579_v54  ;;  %v1997_v54 = vld [vmem:[%s3480_s10 + $0x78] sm:$0xff] }
 0x1e9   :  { %1934 = vmatpush.msra.mxu3 %v1857_v43  ;;  %v1383_v18 = vpop.f32.mrf.mxu1  ;;  %2002 = vmatpush.msrb.mxu1 %v1997_v54 }
 0x1ea   :  { %v3326_v58 = vpop.eup %2198  ;;  %1770 = vmatpush.msra.mxu0 %v1578_v37  ;;  %v1995_v37 = vld [vmem:[%s3480_s10 + $0x68] sm:$0xff] }
 0x1eb   :  { %1935 = vmatpush.msra.mxu3 %v1856_v47  ;;  %v1455_v25 = vrot.slane %v3326_v58, 4 }
 0x1ec   :  { %1771 = vmatpush.msra.mxu0 %v1577_v57  ;;  %v1993_v57 = vld [vmem:[%s3480_s10 + $0x58] sm:$0xff] }
 0x1ed   :  { %1936 = vmatpush.msra.mxu3 %v1855_v50  ;;  %1772 = vmatmul.f32.vlgmr.msra.gmra.mxu0 %v1607_v20  ;;  %v1990_v20 = vld [vmem:[%s3480_s10 + $0x40] sm:$0xff] }
 0x1ee   :  { %1944 = vmatpush.msrb.mxu0 %v1883_v59  ;;  %v1991_v59 = vld [vmem:[%s3480_s10 + $0x48] sm:$0xff] }
 0x1ef   :  { %1937 = vmatpush.msra.mxu3 %v1854_v53 }
 0x1f0   :  { %1945 = vmatpush.msrb.mxu0 %v1882_v60  ;;  %v1989_v60 = vld [vmem:[%s3480_s10 + $0x38] sm:$0xff] }
 0x1f1   :  { %1938 = vmatpush.msra.mxu3 %v1853_v55  ;;  %v1996_v55 = vld [vmem:[%s3480_s10 + $0x70] sm:$0xff] }
 0x1f2   :  { %1946 = vmatpush.msrb.mxu0 %v1881_v48  ;;  %2003 = vmatpush.msrb.mxu1 %v1996_v55  ;;  %v1988_v48 = vld [vmem:[%s3480_s10 + $0x30] sm:$0xff] }
 0x1f3   :  { %1939 = vmatpush.msra.mxu3 %v1852_v56  ;;  %v1994_v56 = vld [vmem:[%s3480_s10 + $0x60] sm:$0xff] }
 0x1f4   :  { %1940 = vmatmul.f32.vlgmr.msra.gmra.mxu3 %v3326_v58  ;;  %1947 = vmatpush.msrb.mxu0 %v1880_v61  ;;  %v1403_v45 = vpop.f32.mrf.mxu2  ;;  %v1992_v58 = vld [vmem:[%s3480_s10 + $0x50] sm:$0xff]  ;;  %v1987_v61 = vld [vmem:[%s3480_s10 + $0x28] sm:$0xff] }
 0x1f5   :  { %2004 = vmatpush.msrb.mxu1 %v1995_v37 }
 0x1f6   :  { %1948 = vmatpush.msrb.mxu0 %v1879_v62  ;;  %v1986_v62 = vld [vmem:[%s3480_s10 + $0x20] sm:$0xff] }
 0x1f7   :  { %2005 = vmatpush.msrb.mxu1 %v1994_v56 }
 0x1f8   :  { %1949 = vmatpush.msrb.mxu0 %v1878_v63  ;;  %v1985_v63 = vld [vmem:[%s3480_s10 + $0x18] sm:$0xff] }
 0x1f9   :  { %2006 = vmatpush.msrb.mxu1 %v1993_v57 }
 0x1fa   :  { %1950 = vmatpush.msrb.mxu0 %v1877_v0 }
 0x1fb   :  { %2007 = vmatpush.msrb.mxu1 %v1992_v58 }
 0x1fc   :  { %1951 = vmatpush.msrb.mxu0 %v1876_v27  ;;  %v1984_v27 = vld [vmem:[%s3480_s10 + $0x10] sm:$0xff] }
 0x1fd   :  { %2008 = vmatpush.msrb.mxu1 %v1991_v59 }
 0x1fe   :  { %1952 = vmatpush.msrb.mxu0 %v1875_v36 }
 0x1ff   :  { %2009 = vmatpush.msrb.mxu1 %v1990_v20 }
 0x200   :  { %1953 = vmatpush.msrb.mxu0 %v1874_v1 }
 0x201   :  { %2010 = vmatpush.msrb.mxu1 %v1989_v60 }
 0x202   :  { %1954 = vmatpush.msrb.mxu0 %v1873_v2 }
 0x203   :  { %2011 = vmatpush.msrb.mxu1 %v1988_v48 }
 0x204   :  { %1955 = vmatpush.msrb.mxu0 %v1872_v3 }
 0x205   :  { %2012 = vmatpush.msrb.mxu1 %v1987_v61 }
 0x206   :  { %1956 = vmatpush.msrb.mxu0 %v1871_v4 }
 0x207   :  { %2013 = vmatpush.msrb.mxu1 %v1986_v62 }
 0x208   :  { %1957 = vmatpush.msrb.mxu0 %v1870_v5 }
 0x209   :  { %2014 = vmatpush.msrb.mxu1 %v1985_v63 }
 0x20a   :  { %1958 = vmatpush.msrb.mxu0 %v1869_v7  ;;  %v1633_v32 = vpop.f32.mrf.mxu1  ;;  %v1982_v7 = vld [vmem:[%s3480_s10] sm:$0xff] }
 0x20b   :  { %v1634_v33 = vadd.f32 %v2184_v42, %v1633_v32  ;;  %2015 = vmatpush.msrb.mxu1 %v1984_v27 }
 0x20c   :  { %1959 = vmatpush.msrb.mxu0 %v1868_v8  ;;  %v2026_v8 = vld [vmem:[#allocation14 + $0x18] sm:$0xff] }
 0x20d   :  { %2016 = vmatpush.msrb.mxu1 %v1983_v6  ;;  %2046 = vmatpush.msrb.mxu2 %v2026_v8 }
 0x20f   :  { %2017 = vmatpush.msrb.mxu1 %v1982_v7  ;;  %2047 = vmatpush.msrb.mxu2 %v2025_v9 }
 0x215   :  { %v1343_v14 = vpop.f32.mrf.mxu3  ;;  %v1653_v34 = vpop.f32.mrf.mxu2 }
 0x216   :  { %v1344_v15 = vadd.f32 %v1343_v14, %v1324_v12  ;;  %v1654_v35 = vadd.f32 %v1653_v34, %v1634_v33 }
 0x21c   :  { %v1363_v16 = vpop.f32.mrf.mxu0 }
 0x21d   :  { %v1364_v17 = vadd.f32 %v1363_v16, %v1344_v15  ;;  %v2024_v16 = vld [vmem:[#allocation14 + $0x8] sm:$0xff] }
 0x21e   :  { %2048 = vmatpush.msrb.mxu2 %v2024_v16 }
 0x21f   :  { %v1384_v13 = vadd.f32 %v1383_v18, %v1364_v17  ;;  %v2023_v17 = vld [vmem:[#allocation14] sm:$0xff]  ;;  %v2185_v18 = vld [vmem:[#allocation13] ss:$0 sm:$0xff] }
 0x220   :  { %2049 = vmatpush.msrb.mxu2 %v2023_v17 }
 0x221   :  { %v1404_v19 = vadd.f32 %v1403_v45, %v1384_v13 }
 0x222   :  { %v1423_v21 = vpop.f32.mrf.mxu3 }
 0x223   :  { %v1424_v22 = vadd.f32 %v1423_v21, %v1404_v19  ;;  %v2057_v21 = vld [vmem:[%s3484_s14 + $0x10] sm:$0xff] }
 0x225   :  { %v1443_v23 = vpop.f32.mrf.mxu0  ;;  %v1713_v43 = vpop.f32.mrf.mxu1 }
 0x226   :  { %v1444_v51 = vadd.f32 %v1443_v23, %v1424_v22  ;;  %v2056_v22 = vld [vmem:[%s3484_s14 + $0x8] sm:$0xff]  ;;  %v2055_v23 = vld [vmem:[%s3484_s14] sm:$0xff] }
 0x228   :  { %2200 = vtanh.f32 %v1444_v51  ;;  %v2186_v51 = vld [vmem:[#allocation16] ss:$0 sm:$0xff] }
 0x22e   :  { %v2201_v24 = vpop.eup %2200  ;;  %v1901_v36 = vpop.f32.mrf.mxu1 }
 0x22f   :  { %v1456_v26 = vrot.slane %v2201_v24, 2  ;;  %1960 = vmatmul.f32.vlgmr.msrb.gmra.mxu0 %v2201_v24 }
 0x230   :  { %v1733_v46 = vpop.f32.mrf.mxu2 }
 0x231   :  { %v1460_v29 = vsel %vm1459_vm7, %v1455_v25, %v1456_v26 }
 0x232   :  { %v1462_v31 = vsel %vm1461_vm8, %v3101_v38, %v1460_v29  ;;  %v2187_v29 = vld [vmem:[#allocation17] ss:$0 sm:$0xff] }
 0x233   :  { %1464 = vst [vmem:[#allocation20] sm:$0xff] %v1462_v31 }
 0x237   :  { %v1673_v39 = vpop.f32.mrf.mxu3 }
 0x238   :  { %v1674_v41 = vadd.f32 %v1673_v39, %v1654_v35  ;;  %v1921_v0 = vpop.f32.mrf.mxu2 }
 0x239   :  { %v1922_v2 = vadd.f32 %v1921_v0, %v1901_v36 }
 0x24a   :  { %v1693_v40 = vpop.f32.mrf.mxu0 }
 0x24b   :  { %v1694_v28 = vadd.f32 %v1693_v40, %v1674_v41 }
 0x24d   :  { %v1714_v44 = vadd.f32 %v1713_v43, %v1694_v28 }
 0x24f   :  { %v1734_v47 = vadd.f32 %v1733_v46, %v1714_v44 }
 0x257   :  { %v1753_v49 = vpop.f32.mrf.mxu3 }
 0x258   :  { %v1754_v50 = vadd.f32 %v1753_v49, %v1734_v47 }
 0x26a   :  { %v1773_v52 = vpop.f32.mrf.mxu0 }
 0x26b   :  { %v3380_v53 = vadd.f32 %v1773_v52, %v1754_v50 }
 0x26d   :  { %v1776_v38 = vmax.f32 %v3380_v53, 0.0 }
 0x26f   :  { %1975 = vrot.lane.b32.xlu0 %v1776_v38, %s2546_s9 }
 0x277   :  { %v1941_v1 = vpop.f32.mrf.mxu3 }
 0x278   :  { %v1942_v3 = vadd.f32 %v1941_v1, %v1922_v2 }
 0x2ac   :  { %v1961_v4 = vpop.f32.mrf.mxu0 }
 0x2ad   :  { %v1962_v5 = vadd.f32 %v1961_v4, %v1942_v3 }
 0x2af   :  { %1971 = vrot.lane.b32.xlu2 %v1962_v5, %s2533_s24 }
 0x2e1   :  { %v1976_v10 = vpop.permute.xlu0 %1975 }
 0x309   :  { %v1972_v11 = vpop.permute.xlu2 %1971 }
 0x30a   :  { %v1978_v12 = vsel %vm258_vm4, %v2846_v30, %v1972_v11  ;;  %v2058_v30 = vld [vmem:[%s3484_s14 + $0x18] sm:$0xff]  ;;  %s2104_s14 = sshll.u32 %s3486_s16, 4  ;;  %s2129_s16 = sshll.u32 %s3488_s18, 4  ;;  %s2105_s14 = int_to_ptr.hbm [resolvable:$true] %s2104_s14  ;;  %s2130_s16 = int_to_ptr.hbm [resolvable:$true] %s2129_s16 }
 0x30b   :  { %v1979_v14 = vsel %vm226_vm1, %v1978_v12, %v1976_v10  ;;  %2078 = vmatpush.msrb.mxu3 %v2058_v30  ;;  %2110 = dma.vmem_to_hbm [thread:$0]  %s2103_s21, 256, %s2105_s14, [#allocation4], %s2536_s20, %s2536_s20, %s2537_s22  }
 0x30c   :  { %v1981_v15 = vsel %vm1980_vm9, %v1979_v14, %v1976_v10 }
 0x30d   :  { %2018 = vmatmul.f32.vlgmr.msrb.gmra.mxu1 %v1981_v15  ;;  %2079 = vmatpush.msrb.mxu3 %v2057_v21 }
 0x30f   :  { %2080 = vmatpush.msrb.mxu3 %v2056_v22 }
 0x311   :  { %2081 = vmatpush.msrb.mxu3 %v2055_v23 }
 0x38a   :  { %v2019_v13 = vpop.f32.mrf.mxu1 }
 0x38b   :  { %v2020_v45 = vadd.f32 %v2185_v18, %v2019_v13 }
 0x38d   :  { %v2022_v19 = vmax.f32 %v2020_v45, 0.0 }
 0x38f   :  { %2086 = vrot.lane.b32.xlu1 %v2022_v19, %s2546_s9  ;;  %2157 = vmatmul.msk.f32.vlgmr.msrb.gmra.mxu2 %vm258_vm4, %v2022_v19  ;;  %s2547_s9 = smov [#allocation20]  }
 0x390   :  { %s2116_s13 = sshll.u32 %s2547_s9, 4  ;;  %s2117_s13 = int_to_ptr.vmem [resolvable:$true] %s2116_s13 }
 0x391   :  { %2121 = dma.vmem_to_hbm [thread:$0]  %s2117_s13, 128, %s2119_s15, [#allocation21]  }
 0x401   :  { %v2087_v32 = vpop.permute.xlu1 %2086 }
 0x402   :  { %v2093_v33 = vsel %vm226_vm1, %v1776_v38, %v2087_v32 }
 0x412   :  { %v2051_v24 = vpop.f32.mrf.mxu2 }
 0x413   :  { %v2052_v25 = vadd.f32 %v2186_v51, %v2051_v24 }
 0x415   :  { %v2054_v26 = vmax.f32 %v2052_v25, 0.0 }
 0x417   :  { %2158 = vmatmul.msk.f32.vlgmr.msrb.gmra.mxu3 %vm258_vm4, %v2054_v26 }
 0x49a   :  { %v2083_v31 = vpop.f32.mrf.mxu3 }
 0x49b   :  { %v2084_v42 = vadd.f32 %v2187_v29, %v2083_v31 }
 0x49d   :  { %2090 = vrot.lane.b32.xlu0 %v2084_v42, %s2549_s2 }
 0x50f   :  { %v2091_v34 = vpop.permute.xlu0 %2090 }
 0x510   :  { %v2094_v35 = vsel %vm1980_vm9, %v2093_v33, %v2091_v34 }
 0x511   :  { %v2096_v39 = vsel %vm2095_vm10, %v2094_v35, 0.0 }
 0x512   :  { %2097 = vst [vmem:[#allocation22] sm:$0x3] %v2096_v39 }
 0x513   :  { %2132 = dma.vmem_to_hbm [thread:$0]  %s2128_s25, 32, %s2130_s16, [#allocation21]  }
 0x514   :  { %2526 = dma.done.wait [#allocation4], 256  }
 0x515   :  { %2527 = vsyncadd [#allocation4], 4294967040 }
 0x516   :  { %2528 = dma.done.wait [#allocation21], 160  }
 0x517   :  { %2529 = vsyncadd [#allocation21], 4294967136 }
 0x518   :  { %2145 = vsyncpa [#allocation3], 1 }
 0x519   :  { %2146 = vsyncpa [#allocation6], 1 }
 0x51a   :  { %2147 = vsyncpa [#allocation9], 1 }
 0x51b   :  { %2148 = vsyncpa [#allocation12], 1 }
 0x51c   :  { %2149 = vsyncpa [#allocation15], 1 }
 0x51d   :  { %2150 = vsyncpa [#allocation18], 1 }
 0x51e   :  { %2151 = vsyncpa [#allocation4], 1 }
 0x51f   :  { %2152 = vsyncpa [#allocation21], 1 }

</bundles_post_ra>
